<compile_context>
chip_gen: v6e
topology: v6e:2x2x1
jax: 0.10.0
libtpu: 0.0.40
codegen_flags: <defaults>
</compile_context>

<pallas_src>
import math
import numpy as np
import jax
import jax.numpy as jnp
from jax.experimental import pallas as pl
from jax.experimental.pallas import tpu as pltpu

# ----- small problem sizes implied by the module -----
B = 2            # batch
L1 = 8           # query / self sequence length
L2 = 16          # encoder (cross-attn key/value) sequence length
DIM = 32         # model dim C
DIM_ATTN = 32    # (== DIM here; the (DIM, 384) weight packing relies on this)
NUM_HEADS = 4
HEAD_DIM = DIM_ATTN // NUM_HEADS
DIM_FFN = 64
EPS = 1e-6
NEG = float(jnp.finfo(jnp.float32).min)   # torch.finfo(float32).min

# column offsets inside the packed (DIM, 384) weight slab
_QKV1 = 0                        # [  0: 96)  self  q|k|v
_O1   = 3 * DIM_ATTN             # [ 96:128)  self  o
_Q2   = _O1 + DIM                # [128:160)  cross q
_KV2  = _Q2 + DIM_ATTN           # [160:224)  cross k|v
_O2   = _KV2 + 2 * DIM_ATTN      # [224:256)  cross o
_GF   = _O2 + DIM                # [256:384)  ffn   gate|fc1
_WCOLS = _GF + 2 * DIM_FFN       # 384 = 3 * 128 (lane-dense slab)


# ---------------- in-kernel helpers (traced inside the Pallas kernel) ----------------
def _rmsnorm(v, w):
    # T5LayerNorm: x * rsqrt(mean(x^2, -1) + eps) * weight
    ms = jnp.mean(v * v, axis=-1, keepdims=True)
    return w * (v * jax.lax.rsqrt(ms + EPS))


def _gelu_tanh(x):
    return 0.5 * x * (1.0 + jnp.tanh(math.sqrt(2.0 / math.pi) * (x + 0.044715 * x ** 3)))


def _mha(q, k, v, wo, bias):
    """q (Lq, DA), k/v (Lk, DA), wo (DA, DIM), bias (H, Lq, Lk) precomputed (NEG = masked)."""
    ctx = []
    for h in range(NUM_HEADS):                      # static unrolled loop over heads
        s = slice(h * HEAD_DIM, (h + 1) * HEAD_DIM)
        logits = jax.lax.dot_general(
            q[:, s], k[:, s], (((1,), (1,)), ((), ())),
            preferred_element_type=jnp.float32) + bias[h]
        logits = logits - jnp.max(logits, axis=-1, keepdims=True)
        e = jnp.exp(logits)
        p = e * pl.reciprocal(jnp.sum(e, axis=-1, keepdims=True), approx=True)
        ctx.append(jnp.dot(p, v[:, s], preferred_element_type=jnp.float32))
    # concat heads along lanes, single output projection (hoisted out of the head loop)
    return jnp.dot(jnp.concatenate(ctx, axis=-1), wo, preferred_element_type=jnp.float32)


# ---------------- the fused Pallas kernel (whole batch in one invocation) ----------------
def t5_block_kernel(x_ref, enc_ref, bself_ref, bcross_ref,
                    w_ref, norm_ref, wfc2_ref, out_ref):
    x = x_ref[...]        # (B*L1, C)
    enc = enc_ref[...]    # (B*L2, C)

    # --- self-attention: x = x + self_attn(norm1(x), mask, pos_bias) ---
    xn = _rmsnorm(x, norm_ref[0:1, :])
    qkv = jnp.dot(xn, w_ref[:, _QKV1:_O1], preferred_element_type=jnp.float32)   # (BL1, 96)
    x = x + _mha(qkv[:, 0:DIM_ATTN],
                 qkv[:, DIM_ATTN:2 * DIM_ATTN],
                 qkv[:, 2 * DIM_ATTN:3 * DIM_ATTN],
                 w_ref[:, _O1:_Q2], bself_ref[...])

    # --- cross-attention: x = x + cross_attn(norm2(x), enc, enc_mask) ---
    xn = _rmsnorm(x, norm_ref[1:2, :])
    q = jnp.dot(xn, w_ref[:, _Q2:_KV2], preferred_element_type=jnp.float32)      # (BL1, 32)
    kv = jnp.dot(enc, w_ref[:, _KV2:_O2], preferred_element_type=jnp.float32)    # (BL2, 64)
    x = x + _mha(q, kv[:, 0:DIM_ATTN], kv[:, DIM_ATTN:2 * DIM_ATTN],
                 w_ref[:, _O2:_GF], bcross_ref[...])

    # --- gated-GELU feed-forward: x = x + fc2(fc1(norm3(x)) * gelu(gate(norm3(x)))) ---
    xn = _rmsnorm(x, norm_ref[2:3, :])
    gf = jnp.dot(xn, w_ref[:, _GF:_WCOLS], preferred_element_type=jnp.float32)   # (BL1, 128)
    h = gf[:, DIM_FFN:] * _gelu_tanh(gf[:, :DIM_FFN])
    x = x + jnp.dot(h, wfc2_ref[...], preferred_element_type=jnp.float32)

    # fp16_clamp is identity for float32 inputs
    out_ref[...] = x


# ---------------- wrapper-side packing / bias construction ----------------
def _pack_params(params):
    (n1w, wq1, wk1, wv1, wo1, n2w, wq2, wk2, wv2, wo2,
     n3w, wgate, wfc1, wfc2) = params
    w_packed = jnp.concatenate(
        [wq1, wk1, wv1, wo1, wq2, wk2, wv2, wo2, wgate, wfc1], axis=1)   # (DIM, 384)
    norm_w = jnp.concatenate([n1w, n2w, n3w], axis=0)                     # (3, DIM)
    return w_packed, norm_w, wfc2


def _build_biases(mask, emask, pos_bias):
    """Fold per-batch key masks + shared pos bias into block-diagonal stacked biases."""
    b, l1 = mask.shape
    l2 = emask.shape[1]
    qb = jnp.repeat(jnp.arange(b), l1)                                    # (B*L1,)
    kb_self = jnp.repeat(jnp.arange(b), l1)
    kb_cross = jnp.repeat(jnp.arange(b), l2)

    valid_self = (qb[:, None] == kb_self[None, :]) & (mask.reshape(-1) != 0)[None, :]
    pos_tiled = jnp.tile(pos_bias[0], (1, b, b))                          # (H, B*L1, B*L1)
    bias_self = jnp.where(valid_self[None], pos_tiled, NEG).astype(jnp.float32)

    valid_cross = (qb[:, None] == kb_cross[None, :]) & (emask.reshape(-1) != 0)[None, :]
    bias_cross = jnp.where(valid_cross, 0.0, NEG).astype(jnp.float32)
    bias_cross = jnp.broadcast_to(bias_cross[None], (NUM_HEADS, b * l1, b * l2))
    return bias_self, bias_cross


# ---------------- wrapper ----------------
def t5_cross_attention(x, mask, enc, emask, pos_bias, params):
    b, l1, c = x.shape
    l2 = enc.shape[1]
    bl1, bl2 = b * l1, b * l2

    w_packed, norm_w, wfc2 = _pack_params(params)
    bias_self, bias_cross = _build_biases(mask, emask, pos_bias)
    x_flat = x.reshape(bl1, c)
    enc_flat = enc.reshape(bl2, c)

    flops = 2 * (
        bl1 * c * 3 * DIM_ATTN            # self qkv projection
        + 2 * bl1 * bl1 * DIM_ATTN        # self logits + ctx (all heads)
        + bl1 * DIM_ATTN * c              # self output projection
        + bl1 * c * DIM_ATTN              # cross q projection
        + bl2 * c * 2 * DIM_ATTN          # cross kv projection
        + 2 * bl1 * bl2 * DIM_ATTN        # cross logits + ctx
        + bl1 * DIM_ATTN * c              # cross output projection
        + bl1 * c * 2 * DIM_FFN           # gate | fc1
        + bl1 * DIM_FFN * c               # fc2
    )
    transcendentals = NUM_HEADS * bl1 * (bl1 + bl2) + bl1 * DIM_FFN + 3 * bl1
    args = (x_flat, enc_flat, bias_self, bias_cross, w_packed, norm_w, wfc2)
    bytes_accessed = int(sum(a.size * a.dtype.itemsize for a in args) + bl1 * c * 4)

    vmem = pl.BlockSpec(memory_space=pltpu.MemorySpace.VMEM)
    out = pl.pallas_call(
        t5_block_kernel,
        out_shape=jax.ShapeDtypeStruct((bl1, c), jnp.float32),
        in_specs=[vmem] * len(args),
        out_specs=vmem,
        cost_estimate=pl.CostEstimate(flops=flops,
                                      transcendentals=transcendentals,
                                      bytes_accessed=bytes_accessed),
    )(*args)
    return out.reshape(b, l1, c)


# ---------------- pure-JAX reference (mirrors the PyTorch forward) ----------------
def ref_forward(x, mask, enc, emask, pos_bias, params):
    (n1w, wq1, wk1, wv1, wo1, n2w, wq2, wk2, wv2, wo2,
     n3w, wgate, wfc1, wfc2) = params

    def rmsnorm(v, w):
        return w * (v * jax.lax.rsqrt(jnp.mean(v * v, -1, keepdims=True) + EPS))

    def attn(xq, xkv, wq, wk, wv, wo, m, pos):
        b = xq.shape[0]
        q = (xq @ wq).reshape(b, -1, NUM_HEADS, HEAD_DIM)
        k = (xkv @ wk).reshape(b, -1, NUM_HEADS, HEAD_DIM)
        v = (xkv @ wv).reshape(b, -1, NUM_HEADS, HEAD_DIM)
        bias = jnp.zeros((b, NUM_HEADS, q.shape[1], k.shape[1]), jnp.float32)
        if pos is not None:
            bias = bias + pos
        bias = jnp.where(m[:, None, None, :] == 0, NEG, bias)
        logits = jnp.einsum('binc,bjnc->bnij', q, k) + bias
        a = jax.nn.softmax(logits, axis=-1)
        o = jnp.einsum('bnij,bjnc->binc', a, v).reshape(b, -1, DIM_ATTN)
        return o @ wo

    x = x + attn(rmsnorm(x, n1w), rmsnorm(x, n1w), wq1, wk1, wv1, wo1, mask, pos_bias)
    x = x + attn(rmsnorm(x, n2w), enc, wq2, wk2, wv2, wo2, emask, None)
    xn = rmsnorm(x, n3w)
    h = (xn @ wfc1) * _gelu_tanh(xn @ wgate)
    return x + h @ wfc2


if __name__ == "__main__":
    key = jax.random.PRNGKey(0)
    keys = jax.random.split(key, 20)

    x = jax.random.normal(keys[0], (B, L1, DIM), jnp.float32)
    enc = jax.random.normal(keys[1], (B, L2, DIM), jnp.float32)
    pos_bias = 0.1 * jax.random.normal(keys[2], (1, NUM_HEADS, L1, L1), jnp.float32)
    mask = jnp.ones((B, L1), jnp.float32).at[1, -2:].set(0.0)     # self-attn key mask
    emask = jnp.ones((B, L2), jnp.float32).at[0, -5:].set(0.0)    # cross-attn key mask

    def w(k, shape):
        return 0.05 * jax.random.normal(k, shape, jnp.float32)

    def normw(k):
        return 1.0 + 0.01 * jax.random.normal(k, (1, DIM), jnp.float32)

    # parameters (Linear weights pre-transposed to (in, out))
    params = (
        normw(keys[3]),                                             # norm1.weight
        w(keys[4], (DIM, DIM_ATTN)), w(keys[5], (DIM, DIM_ATTN)),   # self q, k
        w(keys[6], (DIM, DIM_ATTN)), w(keys[7], (DIM_ATTN, DIM)),   # self v, o
        normw(keys[8]),                                             # norm2.weight
        w(keys[9], (DIM, DIM_ATTN)), w(keys[10], (DIM, DIM_ATTN)),  # cross q, k
        w(keys[11], (DIM, DIM_ATTN)), w(keys[12], (DIM_ATTN, DIM)), # cross v, o
        normw(keys[13]),                                            # norm3.weight
        w(keys[14], (DIM, DIM_FFN)),                                # ffn gate
        w(keys[15], (DIM, DIM_FFN)),                                # ffn fc1
        w(keys[16], (DIM_FFN, DIM)),                                # ffn fc2
    )

    out = t5_cross_attention(x, mask, enc, emask, pos_bias, params)
    out = jax.block_until_ready(out)

    ref = ref_forward(x, mask, enc, emask, pos_bias, params)
    np.testing.assert_allclose(np.asarray(out), np.asarray(ref), rtol=2e-3, atol=2e-3)
    print("KERNEL_OK")
</pallas_src>

<mosaic_0001>
module attributes {stable_mosaic.version = 11 : i64} {
  func.func @t5_block_kernel(%arg0: memref<16x32xf32, #tpu.memory_space<vmem>>, %arg1: memref<32x32xf32, #tpu.memory_space<vmem>>, %arg2: memref<4x16x16xf32, #tpu.memory_space<vmem>>, %arg3: memref<4x16x32xf32, #tpu.memory_space<vmem>>, %arg4: memref<32x384xf32, #tpu.memory_space<vmem>>, %arg5: memref<3x32xf32, #tpu.memory_space<vmem>>, %arg6: memref<64x32xf32, #tpu.memory_space<vmem>>, %arg7: memref<16x32xf32, #tpu.memory_space<vmem>>) attributes {dimension_semantics = [], scalar_prefetch = 0 : i64, scratch_operands = 0 : i64, tpu.core_type = #tpu.core_type<tc>} {
    %c0 = arith.constant 0 : index
    %c0_0 = arith.constant 0 : index
    %0 = vector.load %arg0[%c0, %c0_0] : memref<16x32xf32, #tpu.memory_space<vmem>>, vector<16x32xf32>
    %c0_1 = arith.constant 0 : index
    %c0_2 = arith.constant 0 : index
    %1 = vector.load %arg1[%c0_1, %c0_2] : memref<32x32xf32, #tpu.memory_space<vmem>>, vector<32x32xf32>
    %c0_3 = arith.constant 0 : index
    %c0_4 = arith.constant 0 : index
    %2 = vector.load %arg5[%c0_3, %c0_4] : memref<3x32xf32, #tpu.memory_space<vmem>>, vector<1x32xf32>
    %3 = arith.mulf %0, %0 : vector<16x32xf32>
    %cst = arith.constant dense<0.000000e+00> : vector<16xf32>
    %4 = vector.multi_reduction <add>, %3, %cst [1] : vector<16x32xf32> to vector<16xf32>
    %5 = vector.shape_cast %4 : vector<16xf32> to vector<16x1xf32>
    %cst_5 = arith.constant 3.200000e+01 : f32
    %6 = vector.broadcast %cst_5 : f32 to vector<16x1xf32>
    %7 = arith.divf %5, %6 : vector<16x1xf32>
    %cst_6 = arith.constant 9.99999997E-7 : f32
    %8 = vector.broadcast %cst_6 : f32 to vector<16x1xf32>
    %9 = arith.addf %7, %8 : vector<16x1xf32>
    %10 = math.rsqrt %9 : vector<16x1xf32>
    %11 = vector.broadcast %10 : vector<16x1xf32> to vector<16x32xf32>
    %12 = arith.mulf %0, %11 : vector<16x32xf32>
    %13 = vector.broadcast %2 : vector<1x32xf32> to vector<16x32xf32>
    %14 = arith.mulf %13, %12 : vector<16x32xf32>
    %c0_7 = arith.constant 0 : index
    %c0_8 = arith.constant 0 : index
    %15 = vector.load %arg4[%c0_7, %c0_8] : memref<32x384xf32, #tpu.memory_space<vmem>>, vector<32x96xf32>
    %cst_9 = arith.constant dense<0.000000e+00> : vector<16x96xf32>
    %16 = tpu.matmul %14, %15, %cst_9 {dimension_numbers = #tpu.dot_dimension_numbers<[1], [0], [0], [1], [0, 0, 1, 1], [], []>} : vector<16x32xf32>, vector<32x96xf32>, vector<16x96xf32> -> vector<16x96xf32>
    %17 = vector.extract_strided_slice %16 {offsets = [0, 0], sizes = [16, 32], strides = [1, 1]} : vector<16x96xf32> to vector<16x32xf32>
    %18 = vector.extract_strided_slice %16 {offsets = [0, 32], sizes = [16, 32], strides = [1, 1]} : vector<16x96xf32> to vector<16x32xf32>
    %19 = vector.extract_strided_slice %16 {offsets = [0, 64], sizes = [16, 32], strides = [1, 1]} : vector<16x96xf32> to vector<16x32xf32>
    %c0_10 = arith.constant 0 : index
    %c96 = arith.constant 96 : index
    %20 = vector.load %arg4[%c0_10, %c96] : memref<32x384xf32, #tpu.memory_space<vmem>>, vector<32x32xf32>
    %c0_11 = arith.constant 0 : index
    %c0_12 = arith.constant 0 : index
    %c0_13 = arith.constant 0 : index
    %21 = vector.load %arg2[%c0_11, %c0_12, %c0_13] : memref<4x16x16xf32, #tpu.memory_space<vmem>>, vector<4x16x16xf32>
    %22 = vector.extract_strided_slice %17 {offsets = [0, 0], sizes = [16, 8], strides = [1, 1]} : vector<16x32xf32> to vector<16x8xf32>
    %23 = vector.extract_strided_slice %18 {offsets = [0, 0], sizes = [16, 8], strides = [1, 1]} : vector<16x32xf32> to vector<16x8xf32>
    %cst_14 = arith.constant dense<0.000000e+00> : vector<16x16xf32>
    %24 = tpu.matmul %22, %23, %cst_14 {dimension_numbers = #tpu.dot_dimension_numbers<[1], [1], [0], [0], [0, 0, 1, 0], [], []>} : vector<16x8xf32>, vector<16x8xf32>, vector<16x16xf32> -> vector<16x16xf32>
    %25 = vector.extract_strided_slice %21 {offsets = [0, 0, 0], sizes = [1, 16, 16], strides = [1, 1, 1]} : vector<4x16x16xf32> to vector<1x16x16xf32>
    %26 = vector.shape_cast %25 : vector<1x16x16xf32> to vector<16x16xf32>
    %27 = arith.addf %24, %26 : vector<16x16xf32>
    %cst_15 = arith.constant dense<0xFF800000> : vector<16xf32>
    %28 = vector.multi_reduction <maximumf>, %27, %cst_15 [1] : vector<16x16xf32> to vector<16xf32>
    %29 = vector.shape_cast %28 : vector<16xf32> to vector<16x1xf32>
    %30 = vector.broadcast %29 : vector<16x1xf32> to vector<16x16xf32>
    %31 = arith.subf %27, %30 : vector<16x16xf32>
    %32 = math.exp %31 : vector<16x16xf32>
    %cst_16 = arith.constant dense<0.000000e+00> : vector<16xf32>
    %33 = vector.multi_reduction <add>, %32, %cst_16 [1] : vector<16x16xf32> to vector<16xf32>
    %34 = vector.shape_cast %33 : vector<16xf32> to vector<16x1xf32>
    %35 = tpu.reciprocal %34 {approx = true} : vector<16x1xf32> -> vector<16x1xf32>
    %36 = vector.broadcast %35 : vector<16x1xf32> to vector<16x16xf32>
    %37 = arith.mulf %32, %36 : vector<16x16xf32>
    %38 = vector.extract_strided_slice %19 {offsets = [0, 0], sizes = [16, 8], strides = [1, 1]} : vector<16x32xf32> to vector<16x8xf32>
    %cst_17 = arith.constant dense<0.000000e+00> : vector<16x8xf32>
    %39 = tpu.matmul %37, %38, %cst_17 {dimension_numbers = #tpu.dot_dimension_numbers<[1], [0], [0], [1], [0, 0, 1, 1], [], []>} : vector<16x16xf32>, vector<16x8xf32>, vector<16x8xf32> -> vector<16x8xf32>
    %40 = vector.extract_strided_slice %17 {offsets = [0, 8], sizes = [16, 8], strides = [1, 1]} : vector<16x32xf32> to vector<16x8xf32>
    %41 = vector.extract_strided_slice %18 {offsets = [0, 8], sizes = [16, 8], strides = [1, 1]} : vector<16x32xf32> to vector<16x8xf32>
    %cst_18 = arith.constant dense<0.000000e+00> : vector<16x16xf32>
    %42 = tpu.matmul %40, %41, %cst_18 {dimension_numbers = #tpu.dot_dimension_numbers<[1], [1], [0], [0], [0, 0, 1, 0], [], []>} : vector<16x8xf32>, vector<16x8xf32>, vector<16x16xf32> -> vector<16x16xf32>
    %43 = vector.extract_strided_slice %21 {offsets = [1, 0, 0], sizes = [1, 16, 16], strides = [1, 1, 1]} : vector<4x16x16xf32> to vector<1x16x16xf32>
    %44 = vector.shape_cast %43 : vector<1x16x16xf32> to vector<16x16xf32>
    %45 = arith.addf %42, %44 : vector<16x16xf32>
    %cst_19 = arith.constant dense<0xFF800000> : vector<16xf32>
    %46 = vector.multi_reduction <maximumf>, %45, %cst_19 [1] : vector<16x16xf32> to vector<16xf32>
    %47 = vector.shape_cast %46 : vector<16xf32> to vector<16x1xf32>
    %48 = vector.broadcast %47 : vector<16x1xf32> to vector<16x16xf32>
    %49 = arith.subf %45, %48 : vector<16x16xf32>
    %50 = math.exp %49 : vector<16x16xf32>
    %cst_20 = arith.constant dense<0.000000e+00> : vector<16xf32>
    %51 = vector.multi_reduction <add>, %50, %cst_20 [1] : vector<16x16xf32> to vector<16xf32>
    %52 = vector.shape_cast %51 : vector<16xf32> to vector<16x1xf32>
    %53 = tpu.reciprocal %52 {approx = true} : vector<16x1xf32> -> vector<16x1xf32>
    %54 = vector.broadcast %53 : vector<16x1xf32> to vector<16x16xf32>
    %55 = arith.mulf %50, %54 : vector<16x16xf32>
    %56 = vector.extract_strided_slice %19 {offsets = [0, 8], sizes = [16, 8], strides = [1, 1]} : vector<16x32xf32> to vector<16x8xf32>
    %cst_21 = arith.constant dense<0.000000e+00> : vector<16x8xf32>
    %57 = tpu.matmul %55, %56, %cst_21 {dimension_numbers = #tpu.dot_dimension_numbers<[1], [0], [0], [1], [0, 0, 1, 1], [], []>} : vector<16x16xf32>, vector<16x8xf32>, vector<16x8xf32> -> vector<16x8xf32>
    %58 = vector.extract_strided_slice %17 {offsets = [0, 16], sizes = [16, 8], strides = [1, 1]} : vector<16x32xf32> to vector<16x8xf32>
    %59 = vector.extract_strided_slice %18 {offsets = [0, 16], sizes = [16, 8], strides = [1, 1]} : vector<16x32xf32> to vector<16x8xf32>
    %cst_22 = arith.constant dense<0.000000e+00> : vector<16x16xf32>
    %60 = tpu.matmul %58, %59, %cst_22 {dimension_numbers = #tpu.dot_dimension_numbers<[1], [1], [0], [0], [0, 0, 1, 0], [], []>} : vector<16x8xf32>, vector<16x8xf32>, vector<16x16xf32> -> vector<16x16xf32>
    %61 = vector.extract_strided_slice %21 {offsets = [2, 0, 0], sizes = [1, 16, 16], strides = [1, 1, 1]} : vector<4x16x16xf32> to vector<1x16x16xf32>
    %62 = vector.shape_cast %61 : vector<1x16x16xf32> to vector<16x16xf32>
    %63 = arith.addf %60, %62 : vector<16x16xf32>
    %cst_23 = arith.constant dense<0xFF800000> : vector<16xf32>
    %64 = vector.multi_reduction <maximumf>, %63, %cst_23 [1] : vector<16x16xf32> to vector<16xf32>
    %65 = vector.shape_cast %64 : vector<16xf32> to vector<16x1xf32>
    %66 = vector.broadcast %65 : vector<16x1xf32> to vector<16x16xf32>
    %67 = arith.subf %63, %66 : vector<16x16xf32>
    %68 = math.exp %67 : vector<16x16xf32>
    %cst_24 = arith.constant dense<0.000000e+00> : vector<16xf32>
    %69 = vector.multi_reduction <add>, %68, %cst_24 [1] : vector<16x16xf32> to vector<16xf32>
    %70 = vector.shape_cast %69 : vector<16xf32> to vector<16x1xf32>
    %71 = tpu.reciprocal %70 {approx = true} : vector<16x1xf32> -> vector<16x1xf32>
    %72 = vector.broadcast %71 : vector<16x1xf32> to vector<16x16xf32>
    %73 = arith.mulf %68, %72 : vector<16x16xf32>
    %74 = vector.extract_strided_slice %19 {offsets = [0, 16], sizes = [16, 8], strides = [1, 1]} : vector<16x32xf32> to vector<16x8xf32>
    %cst_25 = arith.constant dense<0.000000e+00> : vector<16x8xf32>
    %75 = tpu.matmul %73, %74, %cst_25 {dimension_numbers = #tpu.dot_dimension_numbers<[1], [0], [0], [1], [0, 0, 1, 1], [], []>} : vector<16x16xf32>, vector<16x8xf32>, vector<16x8xf32> -> vector<16x8xf32>
    %76 = vector.extract_strided_slice %17 {offsets = [0, 24], sizes = [16, 8], strides = [1, 1]} : vector<16x32xf32> to vector<16x8xf32>
    %77 = vector.extract_strided_slice %18 {offsets = [0, 24], sizes = [16, 8], strides = [1, 1]} : vector<16x32xf32> to vector<16x8xf32>
    %cst_26 = arith.constant dense<0.000000e+00> : vector<16x16xf32>
    %78 = tpu.matmul %76, %77, %cst_26 {dimension_numbers = #tpu.dot_dimension_numbers<[1], [1], [0], [0], [0, 0, 1, 0], [], []>} : vector<16x8xf32>, vector<16x8xf32>, vector<16x16xf32> -> vector<16x16xf32>
    %79 = vector.extract_strided_slice %21 {offsets = [3, 0, 0], sizes = [1, 16, 16], strides = [1, 1, 1]} : vector<4x16x16xf32> to vector<1x16x16xf32>
    %80 = vector.shape_cast %79 : vector<1x16x16xf32> to vector<16x16xf32>
    %81 = arith.addf %78, %80 : vector<16x16xf32>
    %cst_27 = arith.constant dense<0xFF800000> : vector<16xf32>
    %82 = vector.multi_reduction <maximumf>, %81, %cst_27 [1] : vector<16x16xf32> to vector<16xf32>
    %83 = vector.shape_cast %82 : vector<16xf32> to vector<16x1xf32>
    %84 = vector.broadcast %83 : vector<16x1xf32> to vector<16x16xf32>
    %85 = arith.subf %81, %84 : vector<16x16xf32>
    %86 = math.exp %85 : vector<16x16xf32>
    %cst_28 = arith.constant dense<0.000000e+00> : vector<16xf32>
    %87 = vector.multi_reduction <add>, %86, %cst_28 [1] : vector<16x16xf32> to vector<16xf32>
    %88 = vector.shape_cast %87 : vector<16xf32> to vector<16x1xf32>
    %89 = tpu.reciprocal %88 {approx = true} : vector<16x1xf32> -> vector<16x1xf32>
    %90 = vector.broadcast %89 : vector<16x1xf32> to vector<16x16xf32>
    %91 = arith.mulf %86, %90 : vector<16x16xf32>
    %92 = vector.extract_strided_slice %19 {offsets = [0, 24], sizes = [16, 8], strides = [1, 1]} : vector<16x32xf32> to vector<16x8xf32>
    %cst_29 = arith.constant dense<0.000000e+00> : vector<16x8xf32>
    %93 = tpu.matmul %91, %92, %cst_29 {dimension_numbers = #tpu.dot_dimension_numbers<[1], [0], [0], [1], [0, 0, 1, 1], [], []>} : vector<16x16xf32>, vector<16x8xf32>, vector<16x8xf32> -> vector<16x8xf32>
    %94 = tpu.concatenate %39, %57, %75, %93 in 1 : vector<16x8xf32>, vector<16x8xf32>, vector<16x8xf32>, vector<16x8xf32> -> vector<16x32xf32>
    %cst_30 = arith.constant dense<0.000000e+00> : vector<16x32xf32>
    %95 = tpu.matmul %94, %20, %cst_30 {dimension_numbers = #tpu.dot_dimension_numbers<[1], [0], [0], [1], [0, 0, 1, 1], [], []>} : vector<16x32xf32>, vector<32x32xf32>, vector<16x32xf32> -> vector<16x32xf32>
    %96 = arith.addf %0, %95 : vector<16x32xf32>
    %c1 = arith.constant 1 : index
    %c0_31 = arith.constant 0 : index
    %97 = vector.load %arg5[%c1, %c0_31] : memref<3x32xf32, #tpu.memory_space<vmem>>, vector<1x32xf32>
    %98 = arith.mulf %96, %96 : vector<16x32xf32>
    %cst_32 = arith.constant dense<0.000000e+00> : vector<16xf32>
    %99 = vector.multi_reduction <add>, %98, %cst_32 [1] : vector<16x32xf32> to vector<16xf32>
    %100 = vector.shape_cast %99 : vector<16xf32> to vector<16x1xf32>
    %cst_33 = arith.constant 3.200000e+01 : f32
    %101 = vector.broadcast %cst_33 : f32 to vector<16x1xf32>
    %102 = arith.divf %100, %101 : vector<16x1xf32>
    %cst_34 = arith.constant 9.99999997E-7 : f32
    %103 = vector.broadcast %cst_34 : f32 to vector<16x1xf32>
    %104 = arith.addf %102, %103 : vector<16x1xf32>
    %105 = math.rsqrt %104 : vector<16x1xf32>
    %106 = vector.broadcast %105 : vector<16x1xf32> to vector<16x32xf32>
    %107 = arith.mulf %96, %106 : vector<16x32xf32>
    %108 = vector.broadcast %97 : vector<1x32xf32> to vector<16x32xf32>
    %109 = arith.mulf %108, %107 : vector<16x32xf32>
    %c0_35 = arith.constant 0 : index
    %c128 = arith.constant 128 : index
    %110 = vector.load %arg4[%c0_35, %c128] : memref<32x384xf32, #tpu.memory_space<vmem>>, vector<32x32xf32>
    %cst_36 = arith.constant dense<0.000000e+00> : vector<16x32xf32>
    %111 = tpu.matmul %109, %110, %cst_36 {dimension_numbers = #tpu.dot_dimension_numbers<[1], [0], [0], [1], [0, 0, 1, 1], [], []>} : vector<16x32xf32>, vector<32x32xf32>, vector<16x32xf32> -> vector<16x32xf32>
    %c0_37 = arith.constant 0 : index
    %c160 = arith.constant 160 : index
    %112 = vector.load %arg4[%c0_37, %c160] : memref<32x384xf32, #tpu.memory_space<vmem>>, vector<32x64xf32>
    %cst_38 = arith.constant dense<0.000000e+00> : vector<32x64xf32>
    %113 = tpu.matmul %1, %112, %cst_38 {dimension_numbers = #tpu.dot_dimension_numbers<[1], [0], [0], [1], [0, 0, 1, 1], [], []>} : vector<32x32xf32>, vector<32x64xf32>, vector<32x64xf32> -> vector<32x64xf32>
    %114 = vector.extract_strided_slice %113 {offsets = [0, 0], sizes = [32, 32], strides = [1, 1]} : vector<32x64xf32> to vector<32x32xf32>
    %115 = vector.extract_strided_slice %113 {offsets = [0, 32], sizes = [32, 32], strides = [1, 1]} : vector<32x64xf32> to vector<32x32xf32>
    %c0_39 = arith.constant 0 : index
    %c224 = arith.constant 224 : index
    %116 = vector.load %arg4[%c0_39, %c224] : memref<32x384xf32, #tpu.memory_space<vmem>>, vector<32x32xf32>
    %c0_40 = arith.constant 0 : index
    %c0_41 = arith.constant 0 : index
    %c0_42 = arith.constant 0 : index
    %117 = vector.load %arg3[%c0_40, %c0_41, %c0_42] : memref<4x16x32xf32, #tpu.memory_space<vmem>>, vector<4x16x32xf32>
    %118 = vector.extract_strided_slice %111 {offsets = [0, 0], sizes = [16, 8], strides = [1, 1]} : vector<16x32xf32> to vector<16x8xf32>
    %119 = vector.extract_strided_slice %114 {offsets = [0, 0], sizes = [32, 8], strides = [1, 1]} : vector<32x32xf32> to vector<32x8xf32>
    %cst_43 = arith.constant dense<0.000000e+00> : vector<16x32xf32>
    %120 = tpu.matmul %118, %119, %cst_43 {dimension_numbers = #tpu.dot_dimension_numbers<[1], [1], [0], [0], [0, 0, 1, 0], [], []>} : vector<16x8xf32>, vector<32x8xf32>, vector<16x32xf32> -> vector<16x32xf32>
    %121 = vector.extract_strided_slice %117 {offsets = [0, 0, 0], sizes = [1, 16, 32], strides = [1, 1, 1]} : vector<4x16x32xf32> to vector<1x16x32xf32>
    %122 = vector.shape_cast %121 : vector<1x16x32xf32> to vector<16x32xf32>
    %123 = arith.addf %120, %122 : vector<16x32xf32>
    %cst_44 = arith.constant dense<0xFF800000> : vector<16xf32>
    %124 = vector.multi_reduction <maximumf>, %123, %cst_44 [1] : vector<16x32xf32> to vector<16xf32>
    %125 = vector.shape_cast %124 : vector<16xf32> to vector<16x1xf32>
    %126 = vector.broadcast %125 : vector<16x1xf32> to vector<16x32xf32>
    %127 = arith.subf %123, %126 : vector<16x32xf32>
    %128 = math.exp %127 : vector<16x32xf32>
    %cst_45 = arith.constant dense<0.000000e+00> : vector<16xf32>
    %129 = vector.multi_reduction <add>, %128, %cst_45 [1] : vector<16x32xf32> to vector<16xf32>
    %130 = vector.shape_cast %129 : vector<16xf32> to vector<16x1xf32>
    %131 = tpu.reciprocal %130 {approx = true} : vector<16x1xf32> -> vector<16x1xf32>
    %132 = vector.broadcast %131 : vector<16x1xf32> to vector<16x32xf32>
    %133 = arith.mulf %128, %132 : vector<16x32xf32>
    %134 = vector.extract_strided_slice %115 {offsets = [0, 0], sizes = [32, 8], strides = [1, 1]} : vector<32x32xf32> to vector<32x8xf32>
    %cst_46 = arith.constant dense<0.000000e+00> : vector<16x8xf32>
    %135 = tpu.matmul %133, %134, %cst_46 {dimension_numbers = #tpu.dot_dimension_numbers<[1], [0], [0], [1], [0, 0, 1, 1], [], []>} : vector<16x32xf32>, vector<32x8xf32>, vector<16x8xf32> -> vector<16x8xf32>
    %136 = vector.extract_strided_slice %111 {offsets = [0, 8], sizes = [16, 8], strides = [1, 1]} : vector<16x32xf32> to vector<16x8xf32>
    %137 = vector.extract_strided_slice %114 {offsets = [0, 8], sizes = [32, 8], strides = [1, 1]} : vector<32x32xf32> to vector<32x8xf32>
    %cst_47 = arith.constant dense<0.000000e+00> : vector<16x32xf32>
    %138 = tpu.matmul %136, %137, %cst_47 {dimension_numbers = #tpu.dot_dimension_numbers<[1], [1], [0], [0], [0, 0, 1, 0], [], []>} : vector<16x8xf32>, vector<32x8xf32>, vector<16x32xf32> -> vector<16x32xf32>
    %139 = vector.extract_strided_slice %117 {offsets = [1, 0, 0], sizes = [1, 16, 32], strides = [1, 1, 1]} : vector<4x16x32xf32> to vector<1x16x32xf32>
    %140 = vector.shape_cast %139 : vector<1x16x32xf32> to vector<16x32xf32>
    %141 = arith.addf %138, %140 : vector<16x32xf32>
    %cst_48 = arith.constant dense<0xFF800000> : vector<16xf32>
    %142 = vector.multi_reduction <maximumf>, %141, %cst_48 [1] : vector<16x32xf32> to vector<16xf32>
    %143 = vector.shape_cast %142 : vector<16xf32> to vector<16x1xf32>
    %144 = vector.broadcast %143 : vector<16x1xf32> to vector<16x32xf32>
    %145 = arith.subf %141, %144 : vector<16x32xf32>
    %146 = math.exp %145 : vector<16x32xf32>
    %cst_49 = arith.constant dense<0.000000e+00> : vector<16xf32>
    %147 = vector.multi_reduction <add>, %146, %cst_49 [1] : vector<16x32xf32> to vector<16xf32>
    %148 = vector.shape_cast %147 : vector<16xf32> to vector<16x1xf32>
    %149 = tpu.reciprocal %148 {approx = true} : vector<16x1xf32> -> vector<16x1xf32>
    %150 = vector.broadcast %149 : vector<16x1xf32> to vector<16x32xf32>
    %151 = arith.mulf %146, %150 : vector<16x32xf32>
    %152 = vector.extract_strided_slice %115 {offsets = [0, 8], sizes = [32, 8], strides = [1, 1]} : vector<32x32xf32> to vector<32x8xf32>
    %cst_50 = arith.constant dense<0.000000e+00> : vector<16x8xf32>
    %153 = tpu.matmul %151, %152, %cst_50 {dimension_numbers = #tpu.dot_dimension_numbers<[1], [0], [0], [1], [0, 0, 1, 1], [], []>} : vector<16x32xf32>, vector<32x8xf32>, vector<16x8xf32> -> vector<16x8xf32>
    %154 = vector.extract_strided_slice %111 {offsets = [0, 16], sizes = [16, 8], strides = [1, 1]} : vector<16x32xf32> to vector<16x8xf32>
    %155 = vector.extract_strided_slice %114 {offsets = [0, 16], sizes = [32, 8], strides = [1, 1]} : vector<32x32xf32> to vector<32x8xf32>
    %cst_51 = arith.constant dense<0.000000e+00> : vector<16x32xf32>
    %156 = tpu.matmul %154, %155, %cst_51 {dimension_numbers = #tpu.dot_dimension_numbers<[1], [1], [0], [0], [0, 0, 1, 0], [], []>} : vector<16x8xf32>, vector<32x8xf32>, vector<16x32xf32> -> vector<16x32xf32>
    %157 = vector.extract_strided_slice %117 {offsets = [2, 0, 0], sizes = [1, 16, 32], strides = [1, 1, 1]} : vector<4x16x32xf32> to vector<1x16x32xf32>
    %158 = vector.shape_cast %157 : vector<1x16x32xf32> to vector<16x32xf32>
    %159 = arith.addf %156, %158 : vector<16x32xf32>
    %cst_52 = arith.constant dense<0xFF800000> : vector<16xf32>
    %160 = vector.multi_reduction <maximumf>, %159, %cst_52 [1] : vector<16x32xf32> to vector<16xf32>
    %161 = vector.shape_cast %160 : vector<16xf32> to vector<16x1xf32>
    %162 = vector.broadcast %161 : vector<16x1xf32> to vector<16x32xf32>
    %163 = arith.subf %159, %162 : vector<16x32xf32>
    %164 = math.exp %163 : vector<16x32xf32>
    %cst_53 = arith.constant dense<0.000000e+00> : vector<16xf32>
    %165 = vector.multi_reduction <add>, %164, %cst_53 [1] : vector<16x32xf32> to vector<16xf32>
    %166 = vector.shape_cast %165 : vector<16xf32> to vector<16x1xf32>
    %167 = tpu.reciprocal %166 {approx = true} : vector<16x1xf32> -> vector<16x1xf32>
    %168 = vector.broadcast %167 : vector<16x1xf32> to vector<16x32xf32>
    %169 = arith.mulf %164, %168 : vector<16x32xf32>
    %170 = vector.extract_strided_slice %115 {offsets = [0, 16], sizes = [32, 8], strides = [1, 1]} : vector<32x32xf32> to vector<32x8xf32>
    %cst_54 = arith.constant dense<0.000000e+00> : vector<16x8xf32>
    %171 = tpu.matmul %169, %170, %cst_54 {dimension_numbers = #tpu.dot_dimension_numbers<[1], [0], [0], [1], [0, 0, 1, 1], [], []>} : vector<16x32xf32>, vector<32x8xf32>, vector<16x8xf32> -> vector<16x8xf32>
    %172 = vector.extract_strided_slice %111 {offsets = [0, 24], sizes = [16, 8], strides = [1, 1]} : vector<16x32xf32> to vector<16x8xf32>
    %173 = vector.extract_strided_slice %114 {offsets = [0, 24], sizes = [32, 8], strides = [1, 1]} : vector<32x32xf32> to vector<32x8xf32>
    %cst_55 = arith.constant dense<0.000000e+00> : vector<16x32xf32>
    %174 = tpu.matmul %172, %173, %cst_55 {dimension_numbers = #tpu.dot_dimension_numbers<[1], [1], [0], [0], [0, 0, 1, 0], [], []>} : vector<16x8xf32>, vector<32x8xf32>, vector<16x32xf32> -> vector<16x32xf32>
    %175 = vector.extract_strided_slice %117 {offsets = [3, 0, 0], sizes = [1, 16, 32], strides = [1, 1, 1]} : vector<4x16x32xf32> to vector<1x16x32xf32>
    %176 = vector.shape_cast %175 : vector<1x16x32xf32> to vector<16x32xf32>
    %177 = arith.addf %174, %176 : vector<16x32xf32>
    %cst_56 = arith.constant dense<0xFF800000> : vector<16xf32>
    %178 = vector.multi_reduction <maximumf>, %177, %cst_56 [1] : vector<16x32xf32> to vector<16xf32>
    %179 = vector.shape_cast %178 : vector<16xf32> to vector<16x1xf32>
    %180 = vector.broadcast %179 : vector<16x1xf32> to vector<16x32xf32>
    %181 = arith.subf %177, %180 : vector<16x32xf32>
    %182 = math.exp %181 : vector<16x32xf32>
    %cst_57 = arith.constant dense<0.000000e+00> : vector<16xf32>
    %183 = vector.multi_reduction <add>, %182, %cst_57 [1] : vector<16x32xf32> to vector<16xf32>
    %184 = vector.shape_cast %183 : vector<16xf32> to vector<16x1xf32>
    %185 = tpu.reciprocal %184 {approx = true} : vector<16x1xf32> -> vector<16x1xf32>
    %186 = vector.broadcast %185 : vector<16x1xf32> to vector<16x32xf32>
    %187 = arith.mulf %182, %186 : vector<16x32xf32>
    %188 = vector.extract_strided_slice %115 {offsets = [0, 24], sizes = [32, 8], strides = [1, 1]} : vector<32x32xf32> to vector<32x8xf32>
    %cst_58 = arith.constant dense<0.000000e+00> : vector<16x8xf32>
    %189 = tpu.matmul %187, %188, %cst_58 {dimension_numbers = #tpu.dot_dimension_numbers<[1], [0], [0], [1], [0, 0, 1, 1], [], []>} : vector<16x32xf32>, vector<32x8xf32>, vector<16x8xf32> -> vector<16x8xf32>
    %190 = tpu.concatenate %135, %153, %171, %189 in 1 : vector<16x8xf32>, vector<16x8xf32>, vector<16x8xf32>, vector<16x8xf32> -> vector<16x32xf32>
    %cst_59 = arith.constant dense<0.000000e+00> : vector<16x32xf32>
    %191 = tpu.matmul %190, %116, %cst_59 {dimension_numbers = #tpu.dot_dimension_numbers<[1], [0], [0], [1], [0, 0, 1, 1], [], []>} : vector<16x32xf32>, vector<32x32xf32>, vector<16x32xf32> -> vector<16x32xf32>
    %192 = arith.addf %96, %191 : vector<16x32xf32>
    %c2 = arith.constant 2 : index
    %c0_60 = arith.constant 0 : index
    %193 = vector.load %arg5[%c2, %c0_60] : memref<3x32xf32, #tpu.memory_space<vmem>>, vector<1x32xf32>
    %194 = arith.mulf %192, %192 : vector<16x32xf32>
    %cst_61 = arith.constant dense<0.000000e+00> : vector<16xf32>
    %195 = vector.multi_reduction <add>, %194, %cst_61 [1] : vector<16x32xf32> to vector<16xf32>
    %196 = vector.shape_cast %195 : vector<16xf32> to vector<16x1xf32>
    %cst_62 = arith.constant 3.200000e+01 : f32
    %197 = vector.broadcast %cst_62 : f32 to vector<16x1xf32>
    %198 = arith.divf %196, %197 : vector<16x1xf32>
    %cst_63 = arith.constant 9.99999997E-7 : f32
    %199 = vector.broadcast %cst_63 : f32 to vector<16x1xf32>
    %200 = arith.addf %198, %199 : vector<16x1xf32>
    %201 = math.rsqrt %200 : vector<16x1xf32>
    %202 = vector.broadcast %201 : vector<16x1xf32> to vector<16x32xf32>
    %203 = arith.mulf %192, %202 : vector<16x32xf32>
    %204 = vector.broadcast %193 : vector<1x32xf32> to vector<16x32xf32>
    %205 = arith.mulf %204, %203 : vector<16x32xf32>
    %c0_64 = arith.constant 0 : index
    %c256 = arith.constant 256 : index
    %206 = vector.load %arg4[%c0_64, %c256] : memref<32x384xf32, #tpu.memory_space<vmem>>, vector<32x128xf32>
    %cst_65 = arith.constant dense<0.000000e+00> : vector<16x128xf32>
    %207 = tpu.matmul %205, %206, %cst_65 {dimension_numbers = #tpu.dot_dimension_numbers<[1], [0], [0], [1], [0, 0, 1, 1], [], []>} : vector<16x32xf32>, vector<32x128xf32>, vector<16x128xf32> -> vector<16x128xf32>
    %208 = vector.extract_strided_slice %207 {offsets = [0, 64], sizes = [16, 64], strides = [1, 1]} : vector<16x128xf32> to vector<16x64xf32>
    %209 = vector.extract_strided_slice %207 {offsets = [0, 0], sizes = [16, 64], strides = [1, 1]} : vector<16x128xf32> to vector<16x64xf32>
    %cst_66 = arith.constant 5.000000e-01 : f32
    %210 = vector.broadcast %cst_66 : f32 to vector<16x64xf32>
    %211 = arith.mulf %210, %209 : vector<16x64xf32>
    %212 = arith.mulf %209, %209 : vector<16x64xf32>
    %213 = arith.mulf %209, %212 : vector<16x64xf32>
    %cst_67 = arith.constant 4.471500e-02 : f32
    %214 = vector.broadcast %cst_67 : f32 to vector<16x64xf32>
    %215 = arith.mulf %214, %213 : vector<16x64xf32>
    %216 = arith.addf %209, %215 : vector<16x64xf32>
    %cst_68 = arith.constant 0.797884583 : f32
    %217 = vector.broadcast %cst_68 : f32 to vector<16x64xf32>
    %218 = arith.mulf %217, %216 : vector<16x64xf32>
    %219 = math.tanh %218 : vector<16x64xf32>
    %cst_69 = arith.constant 1.000000e+00 : f32
    %220 = vector.broadcast %cst_69 : f32 to vector<16x64xf32>
    %221 = arith.addf %220, %219 : vector<16x64xf32>
    %222 = arith.mulf %211, %221 : vector<16x64xf32>
    %223 = arith.mulf %208, %222 : vector<16x64xf32>
    %c0_70 = arith.constant 0 : index
    %c0_71 = arith.constant 0 : index
    %224 = vector.load %arg6[%c0_70, %c0_71] : memref<64x32xf32, #tpu.memory_space<vmem>>, vector<64x32xf32>
    %cst_72 = arith.constant dense<0.000000e+00> : vector<16x32xf32>
    %225 = tpu.matmul %223, %224, %cst_72 {dimension_numbers = #tpu.dot_dimension_numbers<[1], [0], [0], [1], [0, 0, 1, 1], [], []>} : vector<16x64xf32>, vector<64x32xf32>, vector<16x32xf32> -> vector<16x32xf32>
    %226 = arith.addf %192, %225 : vector<16x32xf32>
    %c0_73 = arith.constant 0 : index
    %c0_74 = arith.constant 0 : index
    %227 = vector.load %arg7[%c0_73, %c0_74] : memref<16x32xf32, #tpu.memory_space<vmem>>, vector<16x32xf32>
    tpu.vector_store %arg7[%c0_73, %c0_74], %226 {strides = array<i32>} : memref<16x32xf32, #tpu.memory_space<vmem>>, vector<16x32xf32>,
    return
  }
}

</mosaic_0001>

<bundles_post_ra>
// kernel: tpu_custom_call.1
= control target key start
LH: loop header
LB: loop body
LE: loop exit
PB: predicated region body
PF: predicated region fallthrough
CT: control target
= control target key end

     0   :  { %12 = vsyncpa [#allocation3], 0  ;;  %s3803_s0 = inlined_call_operand.hbm [shape: f32[16,32], index: 0, kind: input, shape index: {}]   ;;  %s3804_s1 = inlined_call_operand.hbm [shape: f32[32,32], index: 1, kind: input, shape index: {}]   ;;  %s3805_s2 = inlined_call_operand.hbm [shape: f32[4,16,16], index: 2, kind: input, shape index: {}]   ;;  %s3806_s3 = inlined_call_operand.hbm [shape: f32[4,16,32], index: 3, kind: input, shape index: {}]   ;;  %s3807_s4 = inlined_call_operand.vmem [shape: f32[32,384], index: 4, kind: input, shape index: {}]   ;;  %s3808_s5 = inlined_call_operand.vmem [shape: f32[3,32], index: 5, kind: input, shape index: {}]   ;;  %s3809_s6 = inlined_call_operand.vmem [shape: f32[64,32], index: 6, kind: input, shape index: {}]   ;;  %s3810_s7 = inlined_call_operand.hbm [shape: f32[16,32], index: 7, kind: output, shape index: {}]  }
   0x1   :  { %13 = vsyncpa [#allocation6], 0 }
   0x2   :  { %14 = vsyncpa [#allocation9], 0 }
   0x3   :  { %15 = vsyncpa [#allocation4], 0  ;;  %s3237_s24 = smov [#allocation5]   ;;  %s3238_s26 = smov [#allocation2]  }
   0x4   :  { %s33_s25 = sshll.u32 %s3237_s24, 4  ;;  %s21_s27 = sshll.u32 %s3238_s26, 4  ;;  %s34_s25 = int_to_ptr.vmem [resolvable:$true] %s33_s25  ;;  %s22_s27 = int_to_ptr.vmem [resolvable:$true] %s21_s27 }
   0x5   :  { %s3137_s28 = scalar_lea.vmem %s34_s25, 512  ;;  %p3142_p1 = scmp.lt.s32.totalorder %s34_s25, %s34_s25 }
   0x6   :  { %p3138_p0 = scmp.ne.s32.totalorder %s34_s25, %s3137_s28  ;;  %p3143_p2 = scmp.lt.s32.totalorder %s3137_s28, %s3137_s28 }
   0x8   :  { %p3144_p3 = por %p3143_p2, %p3142_p1 }
   0xa   :  { %p3145_p4 = pnand %p3144_p3, %p3138_p0 }
   0xc   :  { %3148 = shalt.err (!%p3145_p4)
}
   0xd   :  { %s3239_s29 = smov 128   ;;  %s3240_s30 = smov 8  }
   0xe   :  { %39 = dma.hbm_to_vmem [thread:$0]  %s3804_s1, 512, %s34_s25, [#allocation6], %s3239_s29, %s3239_s29, %s3240_s30  }
   0xf   :  { %s3157_s10 = scalar_lea.vmem %s22_s27, 256  ;;  %p3162_p6 = scmp.lt.s32.totalorder %s22_s27, %s22_s27 }
  0x10   :  { %p3158_p5 = scmp.ne.s32.totalorder %s22_s27, %s3157_s10  ;;  %p3163_p7 = scmp.lt.s32.totalorder %s3157_s10, %s3157_s10 }
  0x12   :  { %p3164_p8 = por %p3163_p7, %p3162_p6 }
  0x14   :  { %p3165_p9 = pnand %p3164_p8, %p3158_p5 }
  0x16   :  { %3168 = shalt.err (!%p3165_p9)
}
  0x17   :  { %27 = dma.hbm_to_vmem [thread:$0]  %s3803_s0, 256, %s22_s27, [#allocation3], %s3239_s29, %s3239_s29, %s3240_s30  }
  0x18   :  { %s3241_s13 = smov [#allocation7]   ;;  %s3242_s15 = smov [#allocation8]  }
  0x19   :  { %s45_s14 = sshll.u32 %s3241_s13, 4  ;;  %s57_s16 = sshll.u32 %s3242_s15, 4  ;;  %s46_s14 = int_to_ptr.vmem [resolvable:$true] %s45_s14  ;;  %s58_s16 = int_to_ptr.vmem [resolvable:$true] %s57_s16 }
  0x1a   :  { %s3177_s1 = scalar_lea.vmem %s46_s14, 1024  ;;  %p3182_p11 = scmp.lt.s32.totalorder %s46_s14, %s46_s14 }
  0x1b   :  { %p3178_p10 = scmp.ne.s32.totalorder %s46_s14, %s3177_s1  ;;  %p3183_p12 = scmp.lt.s32.totalorder %s3177_s1, %s3177_s1 }
  0x1d   :  { %p3184_p13 = por %p3183_p12, %p3182_p11 }
  0x1f   :  { %p3185_p0 = pnand %p3184_p13, %p3178_p10 }
  0x21   :  { %3188 = shalt.err (!%p3185_p0)
}
  0x22   :  { %51 = dma.hbm_to_vmem [thread:$0]  %s3805_s2, 1024, %s46_s14, [#allocation6], %s3239_s29, %s3239_s29, %s3240_s30  }
  0x23   :  { %s3197_s0 = scalar_lea.vmem %s58_s16, 1024  ;;  %p3202_p2 = scmp.lt.s32.totalorder %s58_s16, %s58_s16 }
  0x24   :  { %p3198_p1 = scmp.ne.s32.totalorder %s58_s16, %s3197_s0  ;;  %p3203_p3 = scmp.lt.s32.totalorder %s3197_s0, %s3197_s0 }
  0x26   :  { %p3204_p4 = por %p3203_p3, %p3202_p2 }
  0x28   :  { %p3205_p5 = pnand %p3204_p4, %p3198_p1 }
  0x2a   :  { %3208 = shalt.err (!%p3205_p5)
}
  0x2b   :  { %63 = dma.hbm_to_vmem [thread:$0]  %s3806_s3, 1024, %s58_s16, [#allocation9], %s3239_s29, %s3239_s29, %s3240_s30  }
  0x2c   :  { %3229 = dma.done.wait [#allocation3], 256  }
  0x2d   :  { %3230 = vsyncadd [#allocation3], 4294967040 }
  0x2e   :  { %3231 = dma.done.wait [#allocation6], 1536  }
  0x2f   :  { %3232 = vsyncadd [#allocation6], 4294965760 }
  0x30   :  { %3233 = dma.done.wait [#allocation9], 1024  }
  0x31   :  { %3234 = vsyncadd [#allocation9], 4294966272  ;;  %v3322_v0 = vld [vmem:[#allocation2] sm:$0xff]  ;;  %vm91_vm0 = vcmask 261120   ;;  %v3324_v1 = vld [vmem:[#allocation2 + $0x8] sm:$0xff]  ;;  %vm212_vm1 = vcmask 64512  }
  0x32   :  { %v89_v2 = vmul.f32 %v3322_v0, %v3322_v0  ;;  %v90_v3 = vmul.f32 %v3324_v1, %v3324_v1  ;;  %v3335_v6 = vld [vmem:[%s3807_s4 + $0x48] sm:$0xff]  ;;  %v3340_v7 = vld [vmem:[%s3807_s4 + $0x30] sm:$0xff]  ;;  %v3347_v8 = vld [vmem:[%s3807_s4 + $0x18] sm:$0xff]  ;;  %s3243_s8 = smov 88   ;;  %s3244_s9 = smov 96   ;;  %vm296_vm2 = vcmask 130048  }
  0x33   :  { %2796 = vmatprep.subr.mxu0 %v3335_v6  ;;  %v3356_v9 = vld [vmem:[%s3807_s4] sm:$0xff]  ;;  %s3245_s10 = smov 120   ;;  %v199_v31 = vld [vmem:[#allocation7 + $0x8] sm:$0xff]  ;;  %v198_v33 = vld [vmem:[#allocation7] sm:$0xff]  ;;  %s3246_s11 = smov 64   ;;  %vm1034_vm3 = vcmask 195584  }
  0x34   :  { %v92_v4 = vsel %vm91_vm0, %v89_v2, 0.0  ;;  %v95_v5 = vsel %vm91_vm0, %v90_v3, 0.0  ;;  %2797 = vmatpush3.msra.mxu0 %v3335_v6  ;;  %v2593_v17 = vld [vmem:[%s3808_s5] ss:$0 sm:$0xff]  ;;  %v201_v41 = vld [vmem:[#allocation7 + $0x18] sm:$0xff]  ;;  %s3247_s12 = smov 56  }
  0x35   :  { %93 = vadd.xlane.f32.xlu0 %v92_v4  ;;  %2798 = vmatprep.subr.mxu0 %v3340_v7  ;;  %v200_v40 = vld [vmem:[#allocation7 + $0x10] sm:$0xff]  ;;  %s3248_s13 = smov 80   ;;  %s3249_s14 = smov 72   ;;  %vm2490_vm4 = vcmask 523264  }
  0x36   :  { %2799 = vmatpush3.msra.mxu0 %v3340_v7  ;;  %s3250_s15 = smov 112   ;;  %s3251_s16 = smov 104  }
  0x37   :  { %2800 = vmatprep.subr.mxu0 %v3347_v8  ;;  %s3252_s1 = smov 48   ;;  %s3253_s17 = smov 40  }
  0x38   :  { %2801 = vmatpush3.msra.mxu0 %v3347_v8  ;;  %s3254_s18 = smov 32   ;;  %s3255_s20 = smov 16  }
  0x39   :  { %96 = vadd.xlane.f32.xlu0 %v95_v5  ;;  %2802 = vmatprep.subr.mxu0 %v3356_v9  ;;  %s3256_s21 = smov 24   ;;  %s3257_s28 = smov [#allocation10]  }
  0x3a   :  { %2803 = vmatpush3.msra.mxu0 %v3356_v9 }
  0xbe   :  { %v94_v10 = vpop.xlane.xlu0 %93 }
  0xbf   :  { %v99_v11 = vmul.f32 0.03125, %v94_v10 }
  0xc1   :  { %v101_v12 = vadd.f32 1e-06, %v99_v11 }
  0xc2   :  { %v97_v13 = vpop.xlane.xlu0 %96 }
  0xc3   :  { %3049 = vrsqrt.f32 %v101_v12  ;;  %v100_v14 = vmul.f32 0.03125, %v97_v13 }
  0xc5   :  { %v102_v15 = vadd.f32 1e-06, %v100_v14 }
  0xc7   :  { %3051 = vrsqrt.f32 %v102_v15 }
  0xd0   :  { %v3050_v16 = vpop.eup %3049 }
  0xd1   :  { %v105_v18 = vmul.f32 %v3050_v16, %v3322_v0 }
  0xd3   :  { %v111_v19 = vmul.f32 %v2593_v17, %v105_v18 }
  0xd4   :  { %v3052_v20 = vpop.eup %3051 }
  0xd5   :  { %v106_v21 = vmul.f32 %v3052_v20, %v3324_v1  ;;  %2804 = vmatprep.mubr.msk.f32.mxu0 %vm91_vm0, %v111_v19 }
  0xd7   :  { %v112_v22 = vmul.f32 %v2593_v17, %v106_v21 }
  0xd9   :  { %2805 = vmatmul.mubr.msk.f32.vlgmr.msra.gmra.mxu0 %vm91_vm0, %v112_v22 }
 0x199   :  { %v3367_v23 = vpop.f32.mrf.mxu0 }
 0x19a   :  { %412 = vrot.lane.b32.xlu0 %v3367_v23, %s3243_s8  ;;  %210 = vrot.lane.b32.xlu1 %v3367_v23, %s3244_s9 }
 0x19b   :  { %v3373_v24 = vpop.f32.mrf.mxu0 }
 0x19c   :  { %2811 = vmatprep.mubr.msk.f32.mxu1 %vm212_vm1, %v3373_v24 }
 0x19e   :  { %208 = vrot.lane.b32.xlu1 %v3373_v24, %s3244_s9 }
 0x1a2   :  { %410 = vrot.lane.b32.xlu1 %v3373_v24, %s3243_s8 }
 0x1a6   :  { %406 = vrot.lane.b32.xlu1 %v3373_v24, %s3245_s10 }
 0x1aa   :  { %408 = vrot.lane.b32.xlu1 %v3367_v23, %s3245_s10 }
 0x20c   :  { %v211_v25 = vpop.permute.xlu1 %210  ;;  %v413_v27 = vpop.permute.xlu0 %412 }
 0x20d   :  { %2807 = vmatprep.subr.msk.mxu1 %vm212_vm1, %v211_v25 }
 0x20e   :  { %2808 = vmatpush3.xpose.msk.msra.mxu1 %vm212_vm1, %v211_v25 }
 0x210   :  { %v209_v26 = vpop.permute.xlu1 %208 }
 0x211   :  { %2809 = vmatprep.subr.msk.mxu1 %vm212_vm1, %v209_v26 }
 0x212   :  { %2810 = vmatpush3.xpose.msk.msra.mxu1 %vm212_vm1, %v209_v26 }
 0x213   :  { %2821 = vmatprep.subr.msk.mxu1 %vm212_vm1, %v413_v27 }
 0x214   :  { %v411_v28 = vpop.permute.xlu1 %410 }
 0x215   :  { %2812 = vmatmul.mubr.msk.f32.vlgmr.msra.gmra.mxu1 %vm212_vm1, %v3367_v23 }
 0x216   :  { %2822 = vmatpush3.xpose.msk.msra.mxu1 %vm212_vm1, %v413_v27 }
 0x217   :  { %2823 = vmatprep.subr.msk.mxu1 %vm212_vm1, %v411_v28 }
 0x218   :  { %v407_v29 = vpop.permute.xlu1 %406 }
 0x219   :  { %2825 = vmatprep.mubr.msk.f32.mxu1 %vm212_vm1, %v407_v29 }
 0x21a   :  { %2824 = vmatpush3.xpose.msk.msra.mxu1 %vm212_vm1, %v411_v28 }
 0x21c   :  { %v409_v30 = vpop.permute.xlu1 %408 }
 0x21d   :  { %2826 = vmatmul.mubr.msk.f32.vlgmr.msra.gmra.mxu1 %vm212_vm1, %v409_v30 }
 0x2d5   :  { %v2813_v32 = vpop.f32.mrf.mxu1 }
 0x2d6   :  { %v293_v34 = vadd.f32 %v2813_v32, %v199_v31 }
 0x2d7   :  { %v287_v35 = vpop.f32.mrf.mxu1 }
 0x2d8   :  { %v288_v36 = vadd.f32 %v287_v35, %v198_v33  ;;  %v300_v37 = vsel %vm296_vm2, %v293_v34, -inf }
 0x2d9   :  { %301 = vmax.xlane.f32.xlu0 %v300_v37 }
 0x2da   :  { %v297_v38 = vsel %vm296_vm2, %v288_v36, -inf }
 0x2db   :  { %298 = vmax.xlane.f32.xlu1 %v297_v38 }
 0x2dd   :  { %v2827_v39 = vpop.f32.mrf.mxu1 }
 0x2de   :  { %v494_v44 = vadd.f32 %v2827_v39, %v201_v41 }
 0x2df   :  { %v488_v42 = vpop.f32.mrf.mxu1 }
 0x2e0   :  { %v489_v43 = vadd.f32 %v488_v42, %v200_v40  ;;  %v500_v46 = vsel %vm296_vm2, %v494_v44, -inf  ;;  %v203_v40 = vld [vmem:[#allocation7 + $0x28] sm:$0xff]  ;;  %v204_v42 = vld [vmem:[#allocation7 + $0x30] sm:$0xff] }
 0x2e2   :  { %v497_v45 = vsel %vm296_vm2, %v489_v43, -inf }
 0x2e3   :  { %498 = vmax.xlane.f32.xlu1 %v497_v45 }
 0x2e7   :  { %501 = vmax.xlane.f32.xlu1 %v500_v46  ;;  %v205_v46 = vld [vmem:[#allocation7 + $0x38] sm:$0xff] }
 0x2ef   :  { %321 = vrot.lane.b32.xlu0 %v3367_v23, %s3246_s11 }
 0x2f3   :  { %519 = vrot.lane.b32.xlu0 %v3373_v24, %s3247_s12 }
 0x2f8   :  { %319 = vrot.lane.b32.xlu1 %v3373_v24, %s3246_s11 }
 0x2fc   :  { %521 = vrot.lane.b32.xlu1 %v3367_v23, %s3247_s12 }
 0x300   :  { %612 = vrot.lane.b32.xlu1 %v3367_v23, %s3248_s13 }
 0x362   :  { %v302_v47 = vpop.xlane.xlu0 %301 }
 0x363   :  { %v304_v48 = vsub.f32 %v293_v34, %v302_v47 }
 0x364   :  { %v299_v49 = vpop.xlane.xlu1 %298 }
 0x365   :  { %v307_v50 = vmul.f32 1.442695, %v304_v48  ;;  %v303_v51 = vsub.f32 %v288_v36, %v299_v49 }
 0x366   :  { %v322_v52 = vpop.permute.xlu0 %321 }
 0x367   :  { %3053 = vpow2.f32 %v307_v50  ;;  %v305_v53 = vmul.f32 1.442695, %v303_v51  ;;  %2814 = vmatprep.subr.mxu0 %v322_v52 }
 0x368   :  { %2815 = vmatpush3.msra.mxu0 %v322_v52 }
 0x369   :  { %3055 = vpow2.f32 %v305_v53 }
 0x36a   :  { %v520_v13 = vpop.permute.xlu0 %519 }
 0x36c   :  { %v499_v54 = vpop.xlane.xlu1 %498 }
 0x36d   :  { %v503_v55 = vsub.f32 %v489_v43, %v499_v54 }
 0x36f   :  { %v505_v56 = vmul.f32 1.442695, %v503_v55 }
 0x370   :  { %v502_v57 = vpop.xlane.xlu1 %501 }
 0x371   :  { %3057 = vpow2.f32 %v505_v56  ;;  %v504_v58 = vsub.f32 %v494_v44, %v502_v57  ;;  %v202_v44 = vld [vmem:[#allocation7 + $0x20] sm:$0xff] }
 0x373   :  { %v507_v59 = vmul.f32 1.442695, %v504_v58 }
 0x374   :  { %v3054_v60 = vpop.eup %3053  ;;  %v320_v61 = vpop.permute.xlu1 %319 }
 0x375   :  { %3059 = vpow2.f32 %v507_v59  ;;  %2816 = vmatprep.subr.mxu0 %v320_v61  ;;  %v312_v62 = vsel %vm296_vm2, %v3054_v60, 0.0 }
 0x376   :  { %v3056_v63 = vpop.eup %3055  ;;  %313 = vadd.xlane.f32.xlu1 %v312_v62  ;;  %2817 = vmatpush3.msra.mxu0 %v320_v61 }
 0x377   :  { %v309_v2 = vsel %vm296_vm2, %v3056_v63, 0.0 }
 0x378   :  { %310 = vadd.xlane.f32.xlu0 %v309_v2  ;;  %v522_v3 = vpop.permute.xlu1 %521 }
 0x379   :  { %2828 = vmatprep.subr.mxu0 %v522_v3 }
 0x37c   :  { %v613_v12 = vpop.permute.xlu1 %612 }
 0x37e   :  { %v3058_v4 = vpop.eup %3057 }
 0x37f   :  { %v509_v5 = vsel %vm296_vm2, %v3058_v4, 0.0 }
 0x380   :  { %510 = vadd.xlane.f32.xlu0 %v509_v5 }
 0x382   :  { %v3060_v10 = vpop.eup %3059 }
 0x383   :  { %v512_v11 = vsel %vm296_vm2, %v3060_v10, 0.0 }
 0x384   :  { %513 = vadd.xlane.f32.xlu1 %v512_v11 }
 0x395   :  { %812 = vrot.lane.b32.xlu1 %v3367_v23, %s3249_s14 }
 0x396   :  { %610 = vrot.lane.b32.xlu0 %v3373_v24, %s3248_s13 }
 0x399   :  { %608 = vrot.lane.b32.xlu1 %v3367_v23, %s3250_s15 }
 0x39a   :  { %606 = vrot.lane.b32.xlu0 %v3373_v24, %s3250_s15 }
 0x39d   :  { %806 = vrot.lane.b32.xlu1 %v3373_v24, %s3251_s16 }
 0x39e   :  { %810 = vrot.lane.b32.xlu0 %v3373_v24, %s3249_s14 }
 0x3a2   :  { %808 = vrot.lane.b32.xlu0 %v3367_v23, %s3251_s16 }
 0x3ff   :  { %v314_v14 = vpop.xlane.xlu1 %313 }
 0x400   :  { %3061 = vrcp.f32 %v314_v14 }
 0x401   :  { %v311_v15 = vpop.xlane.xlu0 %310 }
 0x402   :  { %3063 = vrcp.f32 %v311_v15 }
 0x409   :  { %v511_v16 = vpop.xlane.xlu0 %510 }
 0x40a   :  { %3065 = vrcp.f32 %v511_v16 }
 0x40d   :  { %v611_v17 = vpop.permute.xlu0 %610  ;;  %v514_v18 = vpop.xlane.xlu1 %513 }
 0x40e   :  { %v3062_v19 = vpop.eup %3061  ;;  %3067 = vrcp.f32 %v514_v18 }
 0x40f   :  { %v3064_v20 = vpop.eup %3063  ;;  %v318_v26 = vmul.f32 %v3062_v19, %v3054_v60 }
 0x410   :  { %v317_v21 = vmul.f32 %v3064_v20, %v3056_v63 }
 0x411   :  { %v607_v22 = vpop.permute.xlu0 %606  ;;  %v813_v25 = vpop.permute.xlu1 %812 }
 0x412   :  { %2818 = vmatprep.mubr.msk.f32.mxu0 %vm296_vm2, %v317_v21  ;;  %2849 = vmatprep.subr.msk.mxu1 %vm212_vm1, %v813_v25 }
 0x413   :  { %2819 = vmatmul.mubr.msk.f32.vlgmr.msra.gmra.mxu0 %vm296_vm2, %v318_v26  ;;  %2850 = vmatpush3.xpose.msk.msra.mxu1 %vm212_vm1, %v813_v25 }
 0x414   :  { %2829 = vmatpush3.msra.mxu0 %v522_v3 }
 0x415   :  { %2830 = vmatprep.subr.mxu0 %v520_v13  ;;  %v811_v27 = vpop.permute.xlu0 %810  ;;  %v609_v28 = vpop.permute.xlu1 %608 }
 0x416   :  { %2831 = vmatpush3.msra.mxu0 %v520_v13  ;;  %2851 = vmatprep.subr.msk.mxu1 %vm212_vm1, %v811_v27 }
 0x417   :  { %v3066_v29 = vpop.eup %3065  ;;  %2835 = vmatprep.subr.msk.mxu0 %vm212_vm1, %v613_v12  ;;  %2852 = vmatpush3.xpose.msk.msra.mxu1 %vm212_vm1, %v811_v27 }
 0x418   :  { %v517_v30 = vmul.f32 %v3066_v29, %v3058_v4 }
 0x419   :  { %v809_v31 = vpop.permute.xlu0 %808  ;;  %v807_v32 = vpop.permute.xlu1 %806 }
 0x41a   :  { %2832 = vmatprep.mubr.msk.f32.mxu0 %vm296_vm2, %v517_v30  ;;  %2853 = vmatprep.mubr.msk.f32.mxu1 %vm212_vm1, %v807_v32 }
 0x41b   :  { %v3068_v33 = vpop.eup %3067  ;;  %2854 = vmatmul.mubr.msk.f32.vlgmr.msra.gmra.mxu1 %vm212_vm1, %v809_v31 }
 0x41c   :  { %v518_v34 = vmul.f32 %v3068_v33, %v3060_v10  ;;  %v3474_v33 = vld [vmem:[%s3807_s4 + $0x50] sm:$0xff] }
 0x41d   :  { %2874 = vmatprep.subr.mxu1 %v3474_v33 }
 0x41e   :  { %2833 = vmatmul.mubr.msk.f32.vlgmr.msra.gmra.mxu0 %vm296_vm2, %v518_v34  ;;  %2875 = vmatpush3.msra.mxu1 %v3474_v33 }
 0x41f   :  { %2836 = vmatpush3.xpose.msk.msra.mxu0 %vm212_vm1, %v613_v12  ;;  %2839 = vmatprep.mubr.msk.f32.mxu0 %vm212_vm1, %v607_v22 }
 0x420   :  { %2837 = vmatprep.subr.msk.mxu0 %vm212_vm1, %v611_v17 }
 0x423   :  { %2838 = vmatpush3.xpose.msk.msra.mxu0 %vm212_vm1, %v611_v17 }
 0x426   :  { %2840 = vmatmul.mubr.msk.f32.vlgmr.msra.gmra.mxu0 %vm212_vm1, %v609_v28 }
 0x4d3   :  { %v3443_v35 = vpop.f32.mrf.mxu0 }
 0x4d5   :  { %v3445_v36 = vpop.f32.mrf.mxu0 }
 0x4db   :  { %v2855_v38 = vpop.f32.mrf.mxu1 }
 0x4dc   :  { %v894_v51 = vadd.f32 %v2855_v38, %v205_v46 }
 0x4dd   :  { %v888_v41 = vpop.f32.mrf.mxu1 }
 0x4de   :  { %v2834_v37 = vpop.f32.mrf.mxu0  ;;  %v889_v48 = vadd.f32 %v888_v41, %v204_v42  ;;  %v900_v54 = vsel %vm296_vm2, %v894_v51, -inf }
 0x4e0   :  { %v597_v39 = vpop.f32.mrf.mxu0  ;;  %v897_v53 = vsel %vm296_vm2, %v889_v48, -inf }
 0x4e6   :  { %v2841_v43 = vpop.f32.mrf.mxu0 }
 0x4e7   :  { %v694_v45 = vadd.f32 %v2841_v43, %v203_v40 }
 0x4e8   :  { %v688_v47 = vpop.f32.mrf.mxu0 }
 0x4e9   :  { %v689_v49 = vadd.f32 %v688_v47, %v202_v44  ;;  %v700_v50 = vsel %vm296_vm2, %v694_v45, -inf }
 0x4ea   :  { %701 = vmax.xlane.f32.xlu0 %v700_v50 }
 0x4eb   :  { %v697_v52 = vsel %vm296_vm2, %v689_v49, -inf }
 0x4ec   :  { %698 = vmax.xlane.f32.xlu1 %v697_v52 }
 0x4ee   :  { %898 = vmax.xlane.f32.xlu0 %v897_v53 }
 0x4f0   :  { %901 = vmax.xlane.f32.xlu1 %v900_v54 }
 0x573   :  { %v702_v55 = vpop.xlane.xlu0 %701 }
 0x574   :  { %v704_v10 = vsub.f32 %v694_v45, %v702_v55 }
 0x575   :  { %v699_v56 = vpop.xlane.xlu1 %698 }
 0x576   :  { %v703_v5 = vsub.f32 %v689_v49, %v699_v56  ;;  %v707_v12 = vmul.f32 1.442695, %v704_v10 }
 0x577   :  { %v899_v57 = vpop.xlane.xlu0 %898 }
 0x578   :  { %v903_v58 = vsub.f32 %v889_v48, %v899_v57  ;;  %v705_v11 = vmul.f32 1.442695, %v703_v5 }
 0x579   :  { %v902_v59 = vpop.xlane.xlu1 %901 }
 0x57a   :  { %v905_v60 = vmul.f32 1.442695, %v903_v58  ;;  %v904_v61 = vsub.f32 %v894_v51, %v902_v59 }
 0x57c   :  { %3069 = vpow2.f32 %v905_v60  ;;  %v907_v62 = vmul.f32 1.442695, %v904_v61 }
 0x57e   :  { %3071 = vpow2.f32 %v907_v62 }
 0x57f   :  { %3073 = vpow2.f32 %v705_v11 }
 0x580   :  { %3075 = vpow2.f32 %v707_v12  ;;  %v85_v12 = vld [vmem:[#allocation5 + $0x8] sm:$0xff] }
 0x589   :  { %v3070_v63 = vpop.eup %3069 }
 0x58a   :  { %v909_v2 = vsel %vm296_vm2, %v3070_v63, 0.0 }
 0x58b   :  { %v3072_v3 = vpop.eup %3071  ;;  %910 = vadd.xlane.f32.xlu0 %v909_v2 }
 0x58c   :  { %v912_v4 = vsel %vm296_vm2, %v3072_v3, 0.0  ;;  %v3074_v13 = vpop.eup %3073 }
 0x58d   :  { %913 = vadd.xlane.f32.xlu1 %v912_v4  ;;  %v3076_v14 = vpop.eup %3075  ;;  %v709_v15 = vsel %vm296_vm2, %v3074_v13, 0.0 }
 0x58e   :  { %v712_v16 = vsel %vm296_vm2, %v3076_v14, 0.0 }
 0x59e   :  { %719 = vrot.lane.b32.xlu1 %v3373_v24, %s3252_s1 }
 0x5a1   :  { %721 = vrot.lane.b32.xlu0 %v3367_v23, %s3252_s1 }
 0x5c0   :  { %710 = vadd.xlane.f32.xlu0 %v709_v15 }
 0x5c2   :  { %713 = vadd.xlane.f32.xlu1 %v712_v16 }
 0x5d3   :  { %921 = vrot.lane.b32.xlu1 %v3367_v23, %s3253_s17 }
 0x5d6   :  { %919 = vrot.lane.b32.xlu0 %v3373_v24, %s3253_s17 }
 0x5d7   :  { %1047 = vrot.lane.b32.xlu1 %v3335_v6, %s3254_s18 }
 0x5da   :  { %1045 = vrot.lane.b32.xlu0 %v3340_v7, %s3254_s18 }
 0x5db   :  { %1008 = vrot.lane.b32.xlu1 %v597_v39, %s3240_s30 }
 0x5de   :  { %1043 = vrot.lane.b32.xlu0 %v3347_v8, %s3254_s18 }
 0x5df   :  { %1010 = vrot.lane.b32.xlu1 %v2834_v37, %s3240_s30  ;;  %v3481_v37 = vld [vmem:[%s3807_s4 + $0x38] sm:$0xff] }
 0x5e0   :  { %2876 = vmatprep.subr.mxu1 %v3481_v37 }
 0x5e1   :  { %2877 = vmatpush3.msra.mxu1 %v3481_v37 }
 0x614   :  { %v911_v17 = vpop.xlane.xlu0 %910 }
 0x616   :  { %v914_v18 = vpop.xlane.xlu1 %913 }
 0x618   :  { %v722_v19 = vpop.permute.xlu0 %721 }
 0x619   :  { %2842 = vmatprep.subr.mxu0 %v722_v19 }
 0x61a   :  { %2843 = vmatpush3.msra.mxu0 %v722_v19  ;;  %v720_v23 = vpop.permute.xlu1 %719 }
 0x61b   :  { %2844 = vmatprep.subr.mxu0 %v720_v23 }
 0x61c   :  { %2845 = vmatpush3.msra.mxu0 %v720_v23 }
 0x649   :  { %v711_v24 = vpop.xlane.xlu0 %710 }
 0x64a   :  { %3077 = vrcp.f32 %v711_v24 }
 0x64b   :  { %3079 = vrcp.f32 %v911_v17  ;;  %v714_v6 = vpop.xlane.xlu1 %713 }
 0x64c   :  { %3081 = vrcp.f32 %v714_v6 }
 0x64d   :  { %3083 = vrcp.f32 %v914_v18  ;;  %v920_v28 = vpop.permute.xlu0 %919  ;;  %v2622_v18 = vld [vmem:[%s3808_s5 + $0x1] ss:$0 sm:$0xff] }
 0x64f   :  { %v922_v7 = vpop.permute.xlu1 %921 }
 0x650   :  { %2856 = vmatprep.subr.mxu0 %v922_v7 }
 0x651   :  { %v1046_v31 = vpop.permute.xlu0 %1045 }
 0x653   :  { %v1048_v30 = vpop.permute.xlu1 %1047 }
 0x655   :  { %v1044_v32 = vpop.permute.xlu0 %1043 }
 0x657   :  { %v3078_v20 = vpop.eup %3077  ;;  %v1009_v41 = vpop.permute.xlu1 %1008 }
 0x658   :  { %v3080_v8 = vpop.eup %3079  ;;  %v717_v21 = vmul.f32 %v3078_v20, %v3074_v13  ;;  %v86_v13 = vld [vmem:[#allocation5 + $0x10] sm:$0xff] }
 0x659   :  { %v3082_v22 = vpop.eup %3081  ;;  %v917_v27 = vmul.f32 %v3080_v8, %v3070_v63 }
 0x65a   :  { %2846 = vmatprep.mubr.msk.f32.mxu0 %vm296_vm2, %v717_v21  ;;  %v718_v25 = vmul.f32 %v3082_v22, %v3076_v14  ;;  %v3084_v26 = vpop.eup %3083  ;;  %v87_v14 = vld [vmem:[#allocation5 + $0x18] sm:$0xff] }
 0x65b   :  { %v918_v29 = vmul.f32 %v3084_v26, %v3072_v3  ;;  %v1011_v42 = vpop.permute.xlu1 %1010 }
 0x65c   :  { %2847 = vmatmul.mubr.msk.f32.vlgmr.msra.gmra.mxu0 %vm296_vm2, %v718_v25  ;;  %v1031_v49 = vsel %vm212_vm1, %v3443_v35, %v1011_v42  ;;  %v3515_v35 = vld [vmem:[%s3807_s4 + $0x8] sm:$0xff]  ;;  %v1358_v25 = vld [vmem:[#allocation8 + $0x8] sm:$0xff] }
 0x65d   :  { %2857 = vmatpush3.msra.mxu0 %v922_v7  ;;  %2860 = vmatprep.mubr.msk.f32.mxu0 %vm296_vm2, %v917_v27  ;;  %v1357_v27 = vld [vmem:[#allocation8] sm:$0xff] }
 0x65e   :  { %2858 = vmatprep.subr.mxu0 %v920_v28 }
 0x65f   :  { %2859 = vmatpush3.msra.mxu0 %v920_v28 }
 0x660   :  { %2861 = vmatmul.mubr.msk.f32.vlgmr.msra.gmra.mxu0 %vm296_vm2, %v918_v29  ;;  %2863 = vmatprep.subr.mxu0 %v1048_v30 }
 0x661   :  { %2864 = vmatpush3.msra.mxu0 %v1048_v30 }
 0x662   :  { %2865 = vmatprep.subr.mxu0 %v1046_v31 }
 0x663   :  { %2866 = vmatpush3.msra.mxu0 %v1046_v31 }
 0x664   :  { %2867 = vmatprep.subr.mxu0 %v1044_v32 }
 0x665   :  { %2868 = vmatpush3.msra.mxu0 %v1044_v32 }
 0x71c   :  { %v2848_v34 = vpop.f32.mrf.mxu0 }
 0x71d   :  { %1018 = vrot.lane.b32.xlu1 %v2848_v34, %s3255_s20 }
 0x71e   :  { %v797_v38 = vpop.f32.mrf.mxu0 }
 0x71f   :  { %1016 = vrot.lane.b32.xlu0 %v797_v38, %s3255_s20 }
 0x720   :  { %v2862_v39 = vpop.f32.mrf.mxu0 }
 0x721   :  { %1041 = vrot.lane.b32.xlu1 %v3356_v9, %s3254_s18  ;;  %v1030_v9 = vsel %vm212_vm1, %v3445_v36, %v1009_v41  ;;  %v3508_v36 = vld [vmem:[%s3807_s4 + $0x20] sm:$0xff] }
 0x722   :  { %v997_v40 = vpop.f32.mrf.mxu0  ;;  %2878 = vmatprep.subr.mxu1 %v3508_v36 }
 0x723   :  { %1024 = vrot.lane.b32.xlu0 %v997_v40, %s3256_s21  ;;  %2879 = vmatpush3.msra.mxu1 %v3508_v36 }
 0x724   :  { %2880 = vmatprep.subr.mxu1 %v3515_v35 }
 0x725   :  { %1252 = vrot.lane.b32.xlu1 %v3481_v37, %s3244_s9  ;;  %2881 = vmatpush3.msra.mxu1 %v3515_v35 }
 0x727   :  { %1026 = vrot.lane.b32.xlu0 %v2862_v39, %s3256_s21 }
 0x72b   :  { %1254 = vrot.lane.b32.xlu0 %v3474_v33, %s3244_s9 }
 0x78f   :  { %v1019_v43 = vpop.permute.xlu1 %1018 }
 0x790   :  { %v1033_v50 = vsel %vm296_vm2, %v1031_v49, %v1019_v43 }
 0x791   :  { %v1017_v44 = vpop.permute.xlu0 %1016 }
 0x792   :  { %v1032_v46 = vsel %vm296_vm2, %v1030_v9, %v1017_v44 }
 0x793   :  { %v1042_v45 = vpop.permute.xlu1 %1041 }
 0x794   :  { %2869 = vmatprep.subr.mxu0 %v1042_v45 }
 0x795   :  { %v1025_v47 = vpop.permute.xlu0 %1024  ;;  %2870 = vmatpush3.msra.mxu0 %v1042_v45 }
 0x796   :  { %v1035_v48 = vsel %vm1034_vm3, %v1032_v46, %v1025_v47 }
 0x797   :  { %2871 = vmatprep.mubr.msk.f32.mxu0 %vm91_vm0, %v1035_v48  ;;  %v1253_v54 = vpop.permute.xlu1 %1252 }
 0x799   :  { %v1027_v51 = vpop.permute.xlu0 %1026 }
 0x79a   :  { %v1036_v52 = vsel %vm1034_vm3, %v1033_v50, %v1027_v51 }
 0x79b   :  { %2872 = vmatmul.mubr.msk.f32.vlgmr.msra.gmra.mxu0 %vm91_vm0, %v1036_v52 }
 0x79d   :  { %v1255_v53 = vpop.permute.xlu0 %1254 }
 0x79e   :  { %2885 = vmatprep.subr.mxu0 %v1255_v53 }
 0x79f   :  { %2886 = vmatpush3.msra.mxu0 %v1255_v53 }
 0x7a0   :  { %2887 = vmatprep.subr.mxu0 %v1253_v54 }
 0x7a1   :  { %2888 = vmatpush3.msra.mxu0 %v1253_v54 }
 0x85b   :  { %v2873_v55 = vpop.f32.mrf.mxu0 }
 0x85c   :  { %v3520_v56 = vadd.f32 %v2873_v55, %v3324_v1  ;;  %v84_v1 = vld [vmem:[#allocation5] sm:$0xff] }
 0x85d   :  { %v1125_v57 = vpop.f32.mrf.mxu0  ;;  %2893 = vmatprep.mubr.msk.f32.mxu0 %vm91_vm0, %v84_v1 }
 0x85e   :  { %v3523_v58 = vadd.f32 %v1125_v57, %v3322_v0  ;;  %v1138_v59 = vmul.f32 %v3520_v56, %v3520_v56 }
 0x860   :  { %v1142_v60 = vsel %vm91_vm0, %v1138_v59, 0.0  ;;  %v1137_v61 = vmul.f32 %v3523_v58, %v3523_v58 }
 0x861   :  { %1143 = vadd.xlane.f32.xlu0 %v1142_v60 }
 0x862   :  { %v1139_v62 = vsel %vm91_vm0, %v1137_v61, 0.0 }
 0x863   :  { %1140 = vadd.xlane.f32.xlu1 %v1139_v62 }
 0x874   :  { %1250 = vrot.lane.b32.xlu1 %v3508_v36, %s3244_s9 }
 0x877   :  { %1248 = vrot.lane.b32.xlu0 %v3515_v35, %s3244_s9 }
 0x8ea   :  { %v1144_v0 = vpop.xlane.xlu0 %1143 }
 0x8eb   :  { %v1146_v63 = vmul.f32 0.03125, %v1144_v0 }
 0x8ec   :  { %v1141_v2 = vpop.xlane.xlu1 %1140 }
 0x8ed   :  { %v1148_v3 = vadd.f32 1e-06, %v1146_v63  ;;  %v1145_v4 = vmul.f32 0.03125, %v1141_v2  ;;  %v1360_v2 = vld [vmem:[#allocation8 + $0x18] sm:$0xff] }
 0x8ee   :  { %v1249_v11 = vpop.permute.xlu0 %1248 }
 0x8ef   :  { %3085 = vrsqrt.f32 %v1148_v3  ;;  %v1147_v5 = vadd.f32 1e-06, %v1145_v4  ;;  %v1359_v4 = vld [vmem:[#allocation8 + $0x10] sm:$0xff] }
 0x8f0   :  { %v1251_v10 = vpop.permute.xlu1 %1250 }
 0x8f1   :  { %3087 = vrsqrt.f32 %v1147_v5  ;;  %2889 = vmatprep.subr.mxu0 %v1251_v10 }
 0x8f2   :  { %2890 = vmatpush3.msra.mxu0 %v1251_v10 }
 0x8f3   :  { %2891 = vmatprep.subr.mxu0 %v1249_v11 }
 0x8f4   :  { %2892 = vmatpush3.msra.mxu0 %v1249_v11 }
 0x8f5   :  { %2894 = vmatmul.mubr.msk.f32.vlgmr.msra.gmra.mxu0 %vm91_vm0, %v85_v12 }
 0x8f6   :  { %2896 = vmatprep.mubr.msk.f32.mxu0 %vm91_vm0, %v86_v13 }
 0x8f9   :  { %2897 = vmatmul.mubr.msk.f32.gmra.mxu0 %vm91_vm0, %v87_v14 }
 0x8fc   :  { %v3086_v15 = vpop.eup %3085 }
 0x8fd   :  { %v1152_v17 = vmul.f32 %v3086_v15, %v3520_v56 }
 0x8fe   :  { %v3088_v16 = vpop.eup %3087 }
 0x8ff   :  { %v1151_v19 = vmul.f32 %v3088_v16, %v3523_v58  ;;  %v1158_v24 = vmul.f32 %v2622_v18, %v1152_v17 }
 0x901   :  { %v1157_v23 = vmul.f32 %v2622_v18, %v1151_v19 }
 0x903   :  { %2882 = vmatprep.mubr.msk.f32.mxu1 %vm91_vm0, %v1157_v23 }
 0x904   :  { %2883 = vmatmul.mubr.msk.f32.vlgmr.msra.gmra.mxu1 %vm91_vm0, %v1158_v24 }
 0x9b5   :  { %v3546_v6 = vpop.f32.mrf.mxu0 }
 0x9b7   :  { %v3548_v7 = vpop.f32.mrf.mxu0 }
 0x9b9   :  { %v3550_v20 = vpop.f32.mrf.mxu0 }
 0x9ba   :  { %2899 = vmatprep.subr.msk.mxu1 %vm212_vm1, %v3550_v20 }
 0x9bb   :  { %v3554_v8 = vpop.f32.mrf.mxu0  ;;  %2900 = vmatpush3.xpose.msk.msra.mxu1 %vm212_vm1, %v3550_v20 }
 0x9bc   :  { %2901 = vmatprep.subr.msk.mxu1 %vm212_vm1, %v3554_v8 }
 0x9bf   :  { %2902 = vmatpush3.xpose.msk.msra.mxu1 %vm212_vm1, %v3554_v8 }
 0x9c0   :  { %2903 = vmatprep.subr.msk.mxu1 %vm212_vm1, %v3546_v6 }
 0x9c3   :  { %2904 = vmatpush3.xpose.msk.msra.mxu1 %vm212_vm1, %v3546_v6 }
 0x9c4   :  { %v3566_v21 = vpop.f32.mrf.mxu1  ;;  %2905 = vmatprep.subr.msk.mxu1 %vm212_vm1, %v3548_v7 }
 0x9c6   :  { %v3570_v22 = vpop.f32.mrf.mxu1 }
 0x9c7   :  { %2906 = vmatpush3.xpose.msk.msra.mxu1 %vm212_vm1, %v3548_v7  ;;  %2907 = vmatprep.mubr.msk.f32.mxu1 %vm212_vm1, %v3570_v22 }
 0x9ca   :  { %2908 = vmatmul.mubr.msk.f32.vlgmr.msra.gmra.mxu1 %vm212_vm1, %v3566_v21 }
 0xa8a   :  { %v2909_v26 = vpop.f32.mrf.mxu1 }
 0xa8b   :  { %v1455_v28 = vadd.f32 %v2909_v26, %v1358_v25 }
 0xa8c   :  { %v1449_v29 = vpop.f32.mrf.mxu1 }
 0xa8d   :  { %v1450_v30 = vadd.f32 %v1449_v29, %v1357_v27  ;;  %v1461_v31 = vsel %vm91_vm0, %v1455_v28, -inf }
 0xa8e   :  { %1462 = vmax.xlane.f32.xlu0 %v1461_v31 }
 0xa8f   :  { %v1458_v32 = vsel %vm91_vm0, %v1450_v30, -inf }
 0xa90   :  { %1459 = vmax.xlane.f32.xlu1 %v1458_v32 }
 0xaa1   :  { %1484 = vrot.lane.b32.xlu1 %v3554_v8, %s3244_s9 }
 0xaa4   :  { %1486 = vrot.lane.b32.xlu0 %v3550_v20, %s3244_s9 }
 0xaa5   :  { %1482 = vrot.lane.b32.xlu1 %v3546_v6, %s3244_s9 }
 0xb17   :  { %v1463_v34 = vpop.xlane.xlu0 %1462 }
 0xb18   :  { %v1465_v38 = vsub.f32 %v1455_v28, %v1463_v34 }
 0xb19   :  { %v1460_v39 = vpop.xlane.xlu1 %1459 }
 0xb1a   :  { %v1468_v40 = vmul.f32 1.442695, %v1465_v38  ;;  %v1464_v41 = vsub.f32 %v1450_v30, %v1460_v39 }
 0xb1b   :  { %v1487_v42 = vpop.permute.xlu0 %1486 }
 0xb1c   :  { %3089 = vpow2.f32 %v1468_v40  ;;  %v1466_v43 = vmul.f32 1.442695, %v1464_v41  ;;  %2910 = vmatprep.subr.mxu0 %v1487_v42 }
 0xb1d   :  { %2911 = vmatpush3.msra.mxu0 %v1487_v42  ;;  %v1485_v44 = vpop.permute.xlu1 %1484 }
 0xb1e   :  { %3091 = vpow2.f32 %v1466_v43  ;;  %2912 = vmatprep.subr.mxu0 %v1485_v44 }
 0xb1f   :  { %2913 = vmatpush3.msra.mxu0 %v1485_v44 }
 0xb21   :  { %v1483_v45 = vpop.permute.xlu1 %1482 }
 0xb22   :  { %2914 = vmatprep.subr.mxu0 %v1483_v45 }
 0xb23   :  { %2915 = vmatpush3.msra.mxu0 %v1483_v45 }
 0xb29   :  { %v3090_v9 = vpop.eup %3089 }
 0xb2a   :  { %v1473_v46 = vsel %vm91_vm0, %v3090_v9, 0.0 }
 0xb2b   :  { %v3092_v47 = vpop.eup %3091  ;;  %1474 = vadd.xlane.f32.xlu1 %v1473_v46 }
 0xb2c   :  { %v1470_v48 = vsel %vm91_vm0, %v3092_v47, 0.0 }
 0xb2d   :  { %1471 = vadd.xlane.f32.xlu0 %v1470_v48  ;;  %v1362_v48 = vld [vmem:[#allocation8 + $0x28] sm:$0xff] }
 0xb3c   :  { %1583 = vrot.lane.b32.xlu1 %v3550_v20, %s3245_s10 }
 0xb40   :  { %1579 = vrot.lane.b32.xlu1 %v3546_v6, %s3245_s10 }
 0xb43   :  { %1480 = vrot.lane.b32.xlu0 %v3548_v7, %s3244_s9 }
 0xb44   :  { %1573 = vrot.lane.b32.xlu1 %v3570_v22, %s3245_s10 }
 0xb47   :  { %1581 = vrot.lane.b32.xlu0 %v3554_v8, %s3245_s10 }
 0xb4b   :  { %1577 = vrot.lane.b32.xlu0 %v3548_v7, %s3245_s10 }
 0xb4f   :  { %1575 = vrot.lane.b32.xlu0 %v3566_v21, %s3245_s10 }
 0xbb4   :  { %v1475_v49 = vpop.xlane.xlu1 %1474 }
 0xbb5   :  { %3093 = vrcp.f32 %v1475_v49 }
 0xbb6   :  { %v1472_v50 = vpop.xlane.xlu0 %1471 }
 0xbb7   :  { %3095 = vrcp.f32 %v1472_v50  ;;  %v1361_v50 = vld [vmem:[#allocation8 + $0x20] sm:$0xff] }
 0xbb8   :  { %v1584_v52 = vpop.permute.xlu1 %1583 }
 0xbba   :  { %v1481_v51 = vpop.permute.xlu0 %1480 }
 0xbbb   :  { %2916 = vmatprep.subr.mxu0 %v1481_v51 }
 0xbbc   :  { %2917 = vmatpush3.msra.mxu0 %v1481_v51  ;;  %v1580_v53 = vpop.permute.xlu1 %1579 }
 0xbbd   :  { %2921 = vmatprep.subr.msk.mxu0 %vm212_vm1, %v1584_v52 }
 0xbbe   :  { %v1582_v61 = vpop.permute.xlu0 %1581 }
 0xbc0   :  { %v1574_v60 = vpop.permute.xlu1 %1573 }
 0xbc2   :  { %v3094_v54 = vpop.eup %3093  ;;  %v1578_v62 = vpop.permute.xlu0 %1577 }
 0xbc3   :  { %v1479_v59 = vmul.f32 %v3094_v54, %v3090_v9 }
 0xbc4   :  { %v3096_v55 = vpop.eup %3095 }
 0xbc5   :  { %v1478_v57 = vmul.f32 %v3096_v55, %v3092_v47 }
 0xbc6   :  { %v1576_v1 = vpop.permute.xlu0 %1575 }
 0xbc7   :  { %2918 = vmatprep.mubr.msk.f32.mxu0 %vm91_vm0, %v1478_v57 }
 0xbc8   :  { %2919 = vmatmul.mubr.msk.f32.vlgmr.msra.gmra.mxu0 %vm91_vm0, %v1479_v59 }
 0xbc9   :  { %2922 = vmatpush3.xpose.msk.msra.mxu0 %vm212_vm1, %v1584_v52  ;;  %2929 = vmatprep.mubr.msk.f32.mxu0 %vm212_vm1, %v1574_v60 }
 0xbca   :  { %2923 = vmatprep.subr.msk.mxu0 %vm212_vm1, %v1582_v61 }
 0xbcd   :  { %2924 = vmatpush3.xpose.msk.msra.mxu0 %vm212_vm1, %v1582_v61 }
 0xbce   :  { %2925 = vmatprep.subr.msk.mxu0 %vm212_vm1, %v1580_v53 }
 0xbd1   :  { %2926 = vmatpush3.xpose.msk.msra.mxu0 %vm212_vm1, %v1580_v53 }
 0xbd2   :  { %2927 = vmatprep.subr.msk.mxu0 %vm212_vm1, %v1578_v62 }
 0xbd5   :  { %2928 = vmatpush3.xpose.msk.msra.mxu0 %vm212_vm1, %v1578_v62 }
 0xbd8   :  { %2930 = vmatmul.mubr.msk.f32.vlgmr.msra.gmra.mxu0 %vm212_vm1, %v1576_v1 }
 0xc88   :  { %v3614_v0 = vpop.f32.mrf.mxu0 }
 0xc8a   :  { %v3616_v63 = vpop.f32.mrf.mxu0 }
 0xc98   :  { %v2931_v3 = vpop.f32.mrf.mxu0 }
 0xc99   :  { %v1669_v5 = vadd.f32 %v2931_v3, %v1360_v2 }
 0xc9a   :  { %v1663_v10 = vpop.f32.mrf.mxu0 }
 0xc9b   :  { %v1664_v11 = vadd.f32 %v1663_v10, %v1359_v4  ;;  %v1675_v12 = vsel %vm91_vm0, %v1669_v5, -inf }
 0xc9c   :  { %1676 = vmax.xlane.f32.xlu0 %v1675_v12 }
 0xc9d   :  { %v1672_v13 = vsel %vm91_vm0, %v1664_v11, -inf }
 0xc9e   :  { %1673 = vmax.xlane.f32.xlu1 %v1672_v13 }
 0xcaf   :  { %1698 = vrot.lane.b32.xlu1 %v3554_v8, %s3243_s8 }
 0xcb2   :  { %1700 = vrot.lane.b32.xlu0 %v3550_v20, %s3243_s8 }
 0xcb3   :  { %1696 = vrot.lane.b32.xlu1 %v3546_v6, %s3243_s8 }
 0xd25   :  { %v1677_v14 = vpop.xlane.xlu0 %1676 }
 0xd26   :  { %v1679_v15 = vsub.f32 %v1669_v5, %v1677_v14 }
 0xd27   :  { %v1674_v16 = vpop.xlane.xlu1 %1673 }
 0xd28   :  { %v1682_v17 = vmul.f32 1.442695, %v1679_v15  ;;  %v1678_v18 = vsub.f32 %v1664_v11, %v1674_v16 }
 0xd29   :  { %v1701_v19 = vpop.permute.xlu0 %1700 }
 0xd2a   :  { %3097 = vpow2.f32 %v1682_v17  ;;  %v1680_v23 = vmul.f32 1.442695, %v1678_v18  ;;  %2932 = vmatprep.subr.mxu1 %v1701_v19 }
 0xd2b   :  { %2933 = vmatpush3.msra.mxu1 %v1701_v19  ;;  %v1699_v24 = vpop.permute.xlu1 %1698 }
 0xd2c   :  { %3099 = vpow2.f32 %v1680_v23  ;;  %2934 = vmatprep.subr.mxu1 %v1699_v24 }
 0xd2d   :  { %2935 = vmatpush3.msra.mxu1 %v1699_v24 }
 0xd2f   :  { %v1697_v25 = vpop.permute.xlu1 %1696 }
 0xd30   :  { %2936 = vmatprep.subr.mxu1 %v1697_v25 }
 0xd31   :  { %2937 = vmatpush3.msra.mxu1 %v1697_v25 }
 0xd37   :  { %v3098_v26 = vpop.eup %3097 }
 0xd38   :  { %v1687_v27 = vsel %vm91_vm0, %v3098_v26, 0.0 }
 0xd39   :  { %v3100_v28 = vpop.eup %3099  ;;  %1688 = vadd.xlane.f32.xlu1 %v1687_v27 }
 0xd3a   :  { %v1684_v29 = vsel %vm91_vm0, %v3100_v28, 0.0 }
 0xd3b   :  { %1685 = vadd.xlane.f32.xlu0 %v1684_v29  ;;  %v1364_v29 = vld [vmem:[#allocation8 + $0x38] sm:$0xff] }
 0xd4a   :  { %1797 = vrot.lane.b32.xlu1 %v3550_v20, %s3250_s15 }
 0xd4e   :  { %1793 = vrot.lane.b32.xlu1 %v3546_v6, %s3250_s15 }
 0xd51   :  { %1694 = vrot.lane.b32.xlu0 %v3548_v7, %s3243_s8  ;;  %s2579_s8 = sshll.u32 %s3257_s28, 4  ;;  %s2580_s8 = int_to_ptr.vmem [resolvable:$true] %s2579_s8 }
 0xd52   :  { %1787 = vrot.lane.b32.xlu1 %v3570_v22, %s3250_s15  ;;  %p3214_p7 = scmp.lt.s32.totalorder %s2580_s8, %s2580_s8 }
 0xd55   :  { %1795 = vrot.lane.b32.xlu0 %v3554_v8, %s3250_s15 }
 0xd59   :  { %1791 = vrot.lane.b32.xlu0 %v3548_v7, %s3250_s15 }
 0xd5d   :  { %1789 = vrot.lane.b32.xlu0 %v3566_v21, %s3250_s15 }
 0xdc2   :  { %v1689_v30 = vpop.xlane.xlu1 %1688 }
 0xdc3   :  { %3101 = vrcp.f32 %v1689_v30 }
 0xdc4   :  { %v1686_v31 = vpop.xlane.xlu0 %1685 }
 0xdc5   :  { %3103 = vrcp.f32 %v1686_v31  ;;  %v1363_v31 = vld [vmem:[#allocation8 + $0x30] sm:$0xff] }
 0xdc6   :  { %v1798_v34 = vpop.permute.xlu1 %1797 }
 0xdc8   :  { %v1695_v32 = vpop.permute.xlu0 %1694 }
 0xdc9   :  { %2938 = vmatprep.subr.mxu1 %v1695_v32 }
 0xdca   :  { %2939 = vmatpush3.msra.mxu1 %v1695_v32  ;;  %v1794_v38 = vpop.permute.xlu1 %1793 }
 0xdcb   :  { %2943 = vmatprep.subr.msk.mxu1 %vm212_vm1, %v1798_v34 }
 0xdcc   :  { %v1796_v44 = vpop.permute.xlu0 %1795 }
 0xdce   :  { %v1788_v43 = vpop.permute.xlu1 %1787 }
 0xdd0   :  { %v3102_v39 = vpop.eup %3101  ;;  %v1792_v45 = vpop.permute.xlu0 %1791 }
 0xdd1   :  { %v1693_v42 = vmul.f32 %v3102_v39, %v3098_v26 }
 0xdd2   :  { %v3104_v40 = vpop.eup %3103 }
 0xdd3   :  { %v1692_v41 = vmul.f32 %v3104_v40, %v3100_v28 }
 0xdd4   :  { %v1790_v9 = vpop.permute.xlu0 %1789 }
 0xdd5   :  { %2940 = vmatprep.mubr.msk.f32.mxu1 %vm91_vm0, %v1692_v41 }
 0xdd6   :  { %2941 = vmatmul.mubr.msk.f32.vlgmr.msra.gmra.mxu1 %vm91_vm0, %v1693_v42 }
 0xdd7   :  { %2944 = vmatpush3.xpose.msk.msra.mxu1 %vm212_vm1, %v1798_v34  ;;  %2951 = vmatprep.mubr.msk.f32.mxu1 %vm212_vm1, %v1788_v43 }
 0xdd8   :  { %2945 = vmatprep.subr.msk.mxu1 %vm212_vm1, %v1796_v44 }
 0xddb   :  { %2946 = vmatpush3.xpose.msk.msra.mxu1 %vm212_vm1, %v1796_v44 }
 0xddc   :  { %2947 = vmatprep.subr.msk.mxu1 %vm212_vm1, %v1794_v38 }
 0xddf   :  { %2948 = vmatpush3.xpose.msk.msra.mxu1 %vm212_vm1, %v1794_v38 }
 0xde0   :  { %2949 = vmatprep.subr.msk.mxu1 %vm212_vm1, %v1792_v45 }
 0xde3   :  { %2950 = vmatpush3.xpose.msk.msra.mxu1 %vm212_vm1, %v1792_v45 }
 0xde6   :  { %2952 = vmatmul.mubr.msk.f32.vlgmr.msra.gmra.mxu1 %vm212_vm1, %v1790_v9 }
 0xe96   :  { %v3654_v46 = vpop.f32.mrf.mxu1 }
 0xe98   :  { %v3656_v47 = vpop.f32.mrf.mxu1 }
 0xea6   :  { %v2953_v49 = vpop.f32.mrf.mxu1 }
 0xea7   :  { %v1883_v51 = vadd.f32 %v2953_v49, %v1362_v48 }
 0xea8   :  { %v1877_v52 = vpop.f32.mrf.mxu1 }
 0xea9   :  { %v1878_v53 = vadd.f32 %v1877_v52, %v1361_v50  ;;  %v1889_v54 = vsel %vm91_vm0, %v1883_v51, -inf }
 0xeaa   :  { %1890 = vmax.xlane.f32.xlu0 %v1889_v54 }
 0xeab   :  { %v1886_v55 = vsel %vm91_vm0, %v1878_v53, -inf }
 0xeac   :  { %1887 = vmax.xlane.f32.xlu1 %v1886_v55 }
 0xebd   :  { %1912 = vrot.lane.b32.xlu1 %v3554_v8, %s3248_s13 }
 0xec0   :  { %1914 = vrot.lane.b32.xlu0 %v3550_v20, %s3248_s13 }
 0xec1   :  { %1910 = vrot.lane.b32.xlu1 %v3546_v6, %s3248_s13 }
 0xf33   :  { %v1891_v57 = vpop.xlane.xlu0 %1890 }
 0xf34   :  { %v1893_v59 = vsub.f32 %v1883_v51, %v1891_v57 }
 0xf35   :  { %v1888_v60 = vpop.xlane.xlu1 %1887 }
 0xf36   :  { %v1896_v61 = vmul.f32 1.442695, %v1893_v59  ;;  %v1892_v62 = vsub.f32 %v1878_v53, %v1888_v60 }
 0xf37   :  { %v1915_v1 = vpop.permute.xlu0 %1914 }
 0xf38   :  { %3105 = vpow2.f32 %v1896_v61  ;;  %v1894_v2 = vmul.f32 1.442695, %v1892_v62  ;;  %2954 = vmatprep.subr.mxu0 %v1915_v1 }
 0xf39   :  { %2955 = vmatpush3.msra.mxu0 %v1915_v1  ;;  %v1913_v3 = vpop.permute.xlu1 %1912 }
 0xf3a   :  { %3107 = vpow2.f32 %v1894_v2  ;;  %2956 = vmatprep.subr.mxu0 %v1913_v3 }
 0xf3b   :  { %2957 = vmatpush3.msra.mxu0 %v1913_v3 }
 0xf3d   :  { %v1911_v4 = vpop.permute.xlu1 %1910 }
 0xf3e   :  { %2958 = vmatprep.subr.mxu0 %v1911_v4 }
 0xf3f   :  { %2959 = vmatpush3.msra.mxu0 %v1911_v4 }
 0xf45   :  { %v3106_v5 = vpop.eup %3105 }
 0xf46   :  { %v1901_v10 = vsel %vm91_vm0, %v3106_v5, 0.0 }
 0xf47   :  { %v3108_v11 = vpop.eup %3107  ;;  %1902 = vadd.xlane.f32.xlu1 %v1901_v10 }
 0xf48   :  { %v1898_v12 = vsel %vm91_vm0, %v3108_v11, 0.0 }
 0xf49   :  { %1899 = vadd.xlane.f32.xlu0 %v1898_v12 }
 0xf58   :  { %2011 = vrot.lane.b32.xlu1 %v3550_v20, %s3251_s16 }
 0xf5c   :  { %2007 = vrot.lane.b32.xlu1 %v3546_v6, %s3251_s16 }
 0xf5f   :  { %1908 = vrot.lane.b32.xlu0 %v3548_v7, %s3248_s13 }
 0xf60   :  { %2001 = vrot.lane.b32.xlu1 %v3570_v22, %s3251_s16 }
 0xf63   :  { %2009 = vrot.lane.b32.xlu0 %v3554_v8, %s3251_s16 }
 0xf67   :  { %2005 = vrot.lane.b32.xlu0 %v3548_v7, %s3251_s16 }
 0xf6b   :  { %2003 = vrot.lane.b32.xlu0 %v3566_v21, %s3251_s16 }
 0xfd0   :  { %v1903_v13 = vpop.xlane.xlu1 %1902 }
 0xfd1   :  { %3109 = vrcp.f32 %v1903_v13 }
 0xfd2   :  { %v1900_v14 = vpop.xlane.xlu0 %1899 }
 0xfd3   :  { %3111 = vrcp.f32 %v1900_v14 }
 0xfd4   :  { %v2012_v16 = vpop.permute.xlu1 %2011 }
 0xfd6   :  { %v1909_v15 = vpop.permute.xlu0 %1908 }
 0xfd7   :  { %2960 = vmatprep.subr.mxu0 %v1909_v15 }
 0xfd8   :  { %2961 = vmatpush3.msra.mxu0 %v1909_v15  ;;  %v2008_v22 = vpop.permute.xlu1 %2007 }
 0xfd9   :  { %2965 = vmatprep.subr.msk.mxu0 %vm212_vm1, %v2012_v16 }
 0xfda   :  { %v2010_v21 = vpop.permute.xlu0 %2009 }
 0xfdc   :  { %v2002_v24 = vpop.permute.xlu1 %2001 }
 0xfde   :  { %v3110_v17 = vpop.eup %3109  ;;  %v2006_v25 = vpop.permute.xlu0 %2005 }
 0xfdf   :  { %v1907_v23 = vmul.f32 %v3110_v17, %v3106_v5 }
 0xfe0   :  { %v3112_v18 = vpop.eup %3111 }
 0xfe1   :  { %v1906_v19 = vmul.f32 %v3112_v18, %v3108_v11 }
 0xfe2   :  { %v2004_v26 = vpop.permute.xlu0 %2003 }
 0xfe3   :  { %2962 = vmatprep.mubr.msk.f32.mxu0 %vm91_vm0, %v1906_v19  ;;  %v2364_v19 = vld [vmem:[%s3807_s4 + $0x28] sm:$0xff] }
 0xfe4   :  { %2963 = vmatmul.mubr.msk.f32.vlgmr.msra.gmra.mxu0 %vm91_vm0, %v1907_v23  ;;  %v2363_v23 = vld [vmem:[%s3807_s4 + $0x10] sm:$0xff] }
 0xfe5   :  { %2966 = vmatpush3.xpose.msk.msra.mxu0 %vm212_vm1, %v2012_v16  ;;  %2973 = vmatprep.mubr.msk.f32.mxu0 %vm212_vm1, %v2002_v24 }
 0xfe6   :  { %2967 = vmatprep.subr.msk.mxu0 %vm212_vm1, %v2010_v21 }
 0xfe9   :  { %2968 = vmatpush3.xpose.msk.msra.mxu0 %vm212_vm1, %v2010_v21 }
 0xfea   :  { %2969 = vmatprep.subr.msk.mxu0 %vm212_vm1, %v2008_v22 }
 0xfed   :  { %2970 = vmatpush3.xpose.msk.msra.mxu0 %vm212_vm1, %v2008_v22 }
 0xfee   :  { %2971 = vmatprep.subr.msk.mxu0 %vm212_vm1, %v2006_v25 }
 0xff1   :  { %2972 = vmatpush3.xpose.msk.msra.mxu0 %vm212_vm1, %v2006_v25 }
 0xff4   :  { %2974 = vmatmul.mubr.msk.f32.vlgmr.msra.gmra.mxu0 %vm212_vm1, %v2004_v26 }
0x10a4   :  { %v2964_v27 = vpop.f32.mrf.mxu0 }
0x10a6   :  { %v1992_v28 = vpop.f32.mrf.mxu0 }
0x10b4   :  { %v2975_v30 = vpop.f32.mrf.mxu0 }
0x10b5   :  { %v2097_v32 = vadd.f32 %v2975_v30, %v1364_v29 }
0x10b6   :  { %v2091_v34 = vpop.f32.mrf.mxu0 }
0x10b7   :  { %v2092_v38 = vadd.f32 %v2091_v34, %v1363_v31  ;;  %v2103_v39 = vsel %vm91_vm0, %v2097_v32, -inf }
0x10b8   :  { %2104 = vmax.xlane.f32.xlu0 %v2103_v39 }
0x10b9   :  { %v2100_v40 = vsel %vm91_vm0, %v2092_v38, -inf }
0x10ba   :  { %2101 = vmax.xlane.f32.xlu1 %v2100_v40 }
0x10cb   :  { %2126 = vrot.lane.b32.xlu1 %v3554_v8, %s3249_s14 }
0x10ce   :  { %2128 = vrot.lane.b32.xlu0 %v3550_v20, %s3249_s14 }
0x1141   :  { %v2105_v41 = vpop.xlane.xlu0 %2104 }
0x1142   :  { %v2107_v42 = vsub.f32 %v2097_v32, %v2105_v41  ;;  %v2663_v32 = vld [vmem:[%s3808_s5 + $0x2] ss:$0 sm:$0xff] }
0x1143   :  { %v2102_v43 = vpop.xlane.xlu1 %2101 }
0x1144   :  { %v2110_v44 = vmul.f32 1.442695, %v2107_v42  ;;  %v2106_v45 = vsub.f32 %v2092_v38, %v2102_v43 }
0x1145   :  { %v2129_v9 = vpop.permute.xlu0 %2128 }
0x1146   :  { %3113 = vpow2.f32 %v2110_v44  ;;  %v2108_v48 = vmul.f32 1.442695, %v2106_v45  ;;  %2976 = vmatprep.subr.mxu1 %v2129_v9 }
0x1147   :  { %2977 = vmatpush3.msra.mxu1 %v2129_v9  ;;  %v2127_v49 = vpop.permute.xlu1 %2126 }
0x1148   :  { %3115 = vpow2.f32 %v2108_v48  ;;  %2978 = vmatprep.subr.mxu1 %v2127_v49 }
0x1149   :  { %2979 = vmatpush3.msra.mxu1 %v2127_v49 }
0x1153   :  { %v3114_v50 = vpop.eup %3113 }
0x1154   :  { %v2115_v8 = vsel %vm91_vm0, %v3114_v50, 0.0 }
0x1155   :  { %v3116_v51 = vpop.eup %3115  ;;  %2116 = vadd.xlane.f32.xlu1 %v2115_v8 }
0x1156   :  { %v2112_v20 = vsel %vm91_vm0, %v3116_v51, 0.0 }
0x1157   :  { %2113 = vadd.xlane.f32.xlu0 %v2112_v20  ;;  %v2483_v20 = vld [vmem:[%s3809_s6 + $0x38] sm:$0xff] }
0x1166   :  { %2124 = vrot.lane.b32.xlu1 %v3546_v6, %s3249_s14 }
0x116a   :  { %2251 = vrot.lane.b32.xlu1 %v3474_v33, %s3254_s18 }
0x116d   :  { %2122 = vrot.lane.b32.xlu0 %v3548_v7, %s3249_s14 }
0x116e   :  { %2217 = vrot.lane.b32.xlu1 %v3656_v47, %s3240_s30 }
0x1171   :  { %2249 = vrot.lane.b32.xlu0 %v3481_v37, %s3254_s18 }
0x1172   :  { %2219 = vrot.lane.b32.xlu1 %v3654_v46, %s3240_s30 }
0x1175   :  { %2247 = vrot.lane.b32.xlu0 %v3508_v36, %s3254_s18 }
0x1176   :  { %2227 = vrot.lane.b32.xlu1 %v2964_v27, %s3255_s20 }
0x1179   :  { %2225 = vrot.lane.b32.xlu0 %v1992_v28, %s3255_s20 }
0x117a   :  { %2245 = vrot.lane.b32.xlu1 %v3515_v35, %s3254_s18 }
0x11de   :  { %v2117_v33 = vpop.xlane.xlu1 %2116 }
0x11df   :  { %3117 = vrcp.f32 %v2117_v33  ;;  %v2482_v33 = vld [vmem:[%s3809_s6 + $0x30] sm:$0xff] }
0x11e0   :  { %v2114_v6 = vpop.xlane.xlu0 %2113 }
0x11e1   :  { %3119 = vrcp.f32 %v2114_v6  ;;  %v2481_v6 = vld [vmem:[%s3809_s6 + $0x28] sm:$0xff] }
0x11e2   :  { %v2125_v7 = vpop.permute.xlu1 %2124 }
0x11e3   :  { %2980 = vmatprep.subr.mxu1 %v2125_v7 }
0x11e4   :  { %v2123_v37 = vpop.permute.xlu0 %2122  ;;  %2981 = vmatpush3.msra.mxu1 %v2125_v7 }
0x11e5   :  { %2982 = vmatprep.subr.mxu1 %v2123_v37 }
0x11e6   :  { %2983 = vmatpush3.msra.mxu1 %v2123_v37  ;;  %v2252_v46 = vpop.permute.xlu1 %2251  ;;  %v2480_v37 = vld [vmem:[%s3809_s6 + $0x20] sm:$0xff] }
0x11e7   :  { %2987 = vmatprep.subr.mxu1 %v2252_v46 }
0x11e8   :  { %v2250_v52 = vpop.permute.xlu0 %2249 }
0x11ea   :  { %v2218_v55 = vpop.permute.xlu1 %2217 }
0x11eb   :  { %v2239_v2 = vsel %vm212_vm1, %v3616_v63, %v2218_v55  ;;  %v2478_v55 = vld [vmem:[%s3809_s6 + $0x10] sm:$0xff] }
0x11ec   :  { %v3118_v36 = vpop.eup %3117  ;;  %v2248_v35 = vpop.permute.xlu0 %2247 }
0x11ed   :  { %v2121_v54 = vmul.f32 %v3118_v36, %v3114_v50 }
0x11ee   :  { %v3120_v47 = vpop.eup %3119  ;;  %v2220_v57 = vpop.permute.xlu1 %2219 }
0x11ef   :  { %v2120_v53 = vmul.f32 %v3120_v47, %v3116_v51  ;;  %v2240_v10 = vsel %vm212_vm1, %v3614_v0, %v2220_v57 }
0x11f0   :  { %v2226_v1 = vpop.permute.xlu0 %2225 }
0x11f1   :  { %2984 = vmatprep.mubr.msk.f32.mxu1 %vm91_vm0, %v2120_v53  ;;  %v2241_v3 = vsel %vm296_vm2, %v2239_v2, %v2226_v1 }
0x11f2   :  { %2985 = vmatmul.mubr.msk.f32.vlgmr.msra.gmra.mxu1 %vm91_vm0, %v2121_v54  ;;  %v2228_v59 = vpop.permute.xlu1 %2227 }
0x11f3   :  { %2988 = vmatpush3.msra.mxu1 %v2252_v46  ;;  %v2242_v11 = vsel %vm296_vm2, %v2240_v10, %v2228_v59  ;;  %v2477_v59 = vld [vmem:[%s3809_s6 + $0x8] sm:$0xff] }
0x11f4   :  { %2989 = vmatprep.subr.mxu1 %v2250_v52 }
0x11f5   :  { %2990 = vmatpush3.msra.mxu1 %v2250_v52  ;;  %v2479_v52 = vld [vmem:[%s3809_s6 + $0x18] sm:$0xff] }
0x11f6   :  { %2991 = vmatprep.subr.mxu1 %v2248_v35  ;;  %v2246_v60 = vpop.permute.xlu1 %2245 }
0x11f7   :  { %2992 = vmatpush3.msra.mxu1 %v2248_v35 }
0x11f8   :  { %2993 = vmatprep.subr.mxu1 %v2246_v60 }
0x11f9   :  { %2994 = vmatpush3.msra.mxu1 %v2246_v60  ;;  %v2476_v60 = vld [vmem:[%s3809_s6] sm:$0xff]  ;;  %s3209_s6 = scalar_lea.vmem %s2580_s8, 256 }
0x11fa   :  { %3009 = vmatprep.subr.mxu1 %v2483_v20  ;;  %p3210_p6 = scmp.ne.s32.totalorder %s2580_s8, %s3209_s6  ;;  %p3215_p8 = scmp.lt.s32.totalorder %s3209_s6, %s3209_s6 }
0x11fc   :  { %p3216_p9 = por %p3215_p8, %p3214_p7 }
0x11fe   :  { %p3217_p10 = pnand %p3216_p9, %p3210_p6 }
0x12b2   :  { %v2986_v61 = vpop.f32.mrf.mxu1 }
0x12b4   :  { %v2206_v62 = vpop.f32.mrf.mxu1 }
0x12b5   :  { %2233 = vrot.lane.b32.xlu0 %v2206_v62, %s3256_s21 }
0x12b9   :  { %2235 = vrot.lane.b32.xlu0 %v2986_v61, %s3256_s21 }
0x1327   :  { %v2234_v4 = vpop.permute.xlu0 %2233 }
0x1328   :  { %v2243_v5 = vsel %vm1034_vm3, %v2241_v3, %v2234_v4 }
0x1329   :  { %2995 = vmatprep.mubr.msk.f32.mxu1 %vm91_vm0, %v2243_v5 }
0x132b   :  { %v2236_v12 = vpop.permute.xlu0 %2235 }
0x132c   :  { %v2244_v13 = vsel %vm1034_vm3, %v2242_v11, %v2236_v12 }
0x132d   :  { %2996 = vmatmul.mubr.msk.f32.vlgmr.msra.gmra.mxu1 %vm91_vm0, %v2244_v13 }
0x132e   :  { %3010 = vmatpush3.msra.mxu1 %v2483_v20 }
0x132f   :  { %3011 = vmatprep.subr.mxu1 %v2482_v33 }
0x1330   :  { %3012 = vmatpush3.msra.mxu1 %v2482_v33 }
0x1331   :  { %3013 = vmatprep.subr.mxu1 %v2481_v6 }
0x1332   :  { %3014 = vmatpush3.msra.mxu1 %v2481_v6 }
0x1333   :  { %3015 = vmatprep.subr.mxu1 %v2480_v37 }
0x1334   :  { %3016 = vmatpush3.msra.mxu1 %v2480_v37 }
0x1335   :  { %3017 = vmatprep.subr.mxu1 %v2479_v52 }
0x1336   :  { %3018 = vmatpush3.msra.mxu1 %v2479_v52 }
0x1337   :  { %3019 = vmatprep.subr.mxu1 %v2478_v55 }
0x1338   :  { %3020 = vmatpush3.msra.mxu1 %v2478_v55 }
0x1339   :  { %3021 = vmatprep.subr.mxu1 %v2477_v59 }
0x133a   :  { %3022 = vmatpush3.msra.mxu1 %v2477_v59 }
0x133b   :  { %3023 = vmatprep.subr.mxu1 %v2476_v60 }
0x133c   :  { %3024 = vmatpush3.msra.mxu1 %v2476_v60 }
0x13ed   :  { %v2997_v14 = vpop.f32.mrf.mxu1 }
0x13ee   :  { %v3735_v63 = vadd.f32 %v2997_v14, %v3520_v56  ;;  %v2366_v56 = vld [vmem:[%s3807_s4 + $0x58] sm:$0xff] }
0x13ef   :  { %v2329_v15 = vpop.f32.mrf.mxu1  ;;  %2998 = vmatprep.subr.mxu0 %v2366_v56 }
0x13f0   :  { %v3738_v16 = vadd.f32 %v2329_v15, %v3523_v58  ;;  %v2342_v22 = vmul.f32 %v3735_v63, %v3735_v63  ;;  %v2365_v58 = vld [vmem:[%s3807_s4 + $0x40] sm:$0xff]  ;;  %2999 = vmatpush3.msra.mxu0 %v2366_v56 }
0x13f1   :  { %3000 = vmatprep.subr.mxu0 %v2365_v58 }
0x13f2   :  { %v2346_v0 = vsel %vm91_vm0, %v2342_v22, 0.0  ;;  %v2341_v17 = vmul.f32 %v3738_v16, %v3738_v16  ;;  %3001 = vmatpush3.msra.mxu0 %v2365_v58 }
0x13f3   :  { %2347 = vadd.xlane.f32.xlu0 %v2346_v0  ;;  %3002 = vmatprep.subr.mxu0 %v2364_v19 }
0x13f4   :  { %v2343_v18 = vsel %vm91_vm0, %v2341_v17, 0.0  ;;  %3003 = vmatpush3.msra.mxu0 %v2364_v19 }
0x13f5   :  { %2344 = vadd.xlane.f32.xlu1 %v2343_v18  ;;  %3004 = vmatprep.subr.mxu0 %v2363_v23 }
0x13f6   :  { %3005 = vmatpush3.msra.mxu0 %v2363_v23 }
0x147c   :  { %v2348_v24 = vpop.xlane.xlu0 %2347 }
0x147d   :  { %v2350_v21 = vmul.f32 0.03125, %v2348_v24 }
0x147e   :  { %v2345_v25 = vpop.xlane.xlu1 %2344 }
0x147f   :  { %v2352_v26 = vadd.f32 1e-06, %v2350_v21  ;;  %v2349_v27 = vmul.f32 0.03125, %v2345_v25 }
0x1481   :  { %3121 = vrsqrt.f32 %v2352_v26  ;;  %v2351_v28 = vadd.f32 1e-06, %v2349_v27 }
0x1483   :  { %3123 = vrsqrt.f32 %v2351_v28 }
0x148e   :  { %v3122_v29 = vpop.eup %3121 }
0x148f   :  { %v2356_v31 = vmul.f32 %v3122_v29, %v3735_v63 }
0x1490   :  { %v3124_v30 = vpop.eup %3123 }
0x1491   :  { %v2355_v34 = vmul.f32 %v3124_v30, %v3738_v16  ;;  %v2362_v39 = vmul.f32 %v2663_v32, %v2356_v31 }
0x1493   :  { %v2361_v38 = vmul.f32 %v2663_v32, %v2355_v34 }
0x1495   :  { %3006 = vmatprep.mubr.msk.f32.mxu0 %vm91_vm0, %v2361_v38 }
0x1496   :  { %3007 = vmatmul.mubr.msk.f32.vlgmr.msra.gmra.mxu0 %vm91_vm0, %v2362_v39 }
0x1556   :  { %v3008_v40 = vpop.f32.mrf.mxu0 }
0x1557   :  { %v2451_v41 = vmul.f32 %v3008_v40, %v3008_v40  ;;  %v2449_v46 = vmul.f32 0.5, %v3008_v40 }
0x1558   :  { %v2439_v42 = vpop.f32.mrf.mxu0 }
0x1559   :  { %v2453_v43 = vmul.f32 %v3008_v40, %v2451_v41  ;;  %v2450_v44 = vmul.f32 %v2439_v42, %v2439_v42  ;;  %v2448_v53 = vmul.f32 0.5, %v2439_v42 }
0x155b   :  { %v2455_v45 = vmul.f32 0.044715, %v2453_v43  ;;  %v2452_v9 = vmul.f32 %v2450_v44, %v2439_v42 }
0x155d   :  { %v2457_v48 = vadd.f32 %v3008_v40, %v2455_v45  ;;  %v2454_v49 = vmul.f32 0.044715, %v2452_v9 }
0x155f   :  { %v2459_v50 = vmul.f32 0.7978846, %v2457_v48  ;;  %v2456_v8 = vadd.f32 %v2454_v49, %v2439_v42 }
0x1561   :  { %3125 = vtanh.f32 %v2459_v50  ;;  %v2458_v51 = vmul.f32 0.7978846, %v2456_v8 }
0x1563   :  { %3127 = vtanh.f32 %v2458_v51 }
0x156e   :  { %v3126_v7 = vpop.eup %3125 }
0x156f   :  { %v2463_v36 = vadd.f32 1.0, %v3126_v7 }
0x1570   :  { %v3128_v47 = vpop.eup %3127 }
0x1571   :  { %v2465_v54 = vmul.f32 %v2463_v36, %v2449_v46  ;;  %v2462_v35 = vadd.f32 1.0, %v3128_v47 }
0x1573   :  { %2470 = vrot.lane.b32.xlu1 %v2465_v54, %s3246_s11  ;;  %v2464_v57 = vmul.f32 %v2462_v35, %v2448_v53 }
0x1575   :  { %2468 = vrot.lane.b32.xlu0 %v2464_v57, %s3246_s11 }
0x15e5   :  { %v2471_v61 = vpop.permute.xlu1 %2470 }
0x15e6   :  { %v2475_v62 = vmul.f32 %v3008_v40, %v2471_v61 }
0x15e7   :  { %v2469_v1 = vpop.permute.xlu0 %2468 }
0x15e8   :  { %v2474_v2 = vmul.f32 %v2469_v1, %v2439_v42  ;;  %2488 = vrot.lane.b32.xlu0 %v2475_v62, %s3246_s11 }
0x15ea   :  { %2486 = vrot.lane.b32.xlu1 %v2474_v2, %s3246_s11 }
0x165a   :  { %v2489_v4 = vpop.permute.xlu0 %2488 }
0x165c   :  { %v2487_v3 = vpop.permute.xlu1 %2486 }
0x165d   :  { %3025 = vmatprep.mubr.msk.f32.mxu1 %vm2490_vm4, %v2487_v3 }
0x165e   :  { %3026 = vmatmul.mubr.msk.f32.vlgmr.msra.gmra.mxu1 %vm2490_vm4, %v2489_v4 }
0x171e   :  { %v3027_v5 = vpop.f32.mrf.mxu1 }
0x171f   :  { %v2571_v10 = vadd.f32 %v3027_v5, %v3735_v63 }
0x1720   :  { %v2561_v11 = vpop.f32.mrf.mxu1 }
0x1721   :  { %2573 = vst.msk [vmem:[#allocation10 + $0x8] sm:$0xff] %vm91_vm0, %v2571_v10  ;;  %v2570_v12 = vadd.f32 %v2561_v11, %v3738_v16 }
0x1723   :  { %2572 = vst.msk [vmem:[#allocation10] sm:$0xff] %vm91_vm0, %v2570_v12 }
0x1724   :  { %3220 = shalt.err (!%p3217_p10)
}
0x1725   :  { %2585 = dma.vmem_to_hbm [thread:$0]  %s2580_s8, 256, %s3810_s7, [#allocation4], %s3239_s29, %s3239_s29, %s3240_s30  }
0x1726   :  { %3235 = dma.done.wait [#allocation4], 256  }
0x1727   :  { %3236 = vsyncadd [#allocation4], 4294967040 }
0x1728   :  { %2589 = vsyncpa [#allocation3], 1 }
0x1729   :  { %2590 = vsyncpa [#allocation6], 1 }
0x172a   :  { %2591 = vsyncpa [#allocation9], 1 }
0x172b   :  { %2592 = vsyncpa [#allocation4], 1 }

</bundles_post_ra>
